<compile_context>
chip_gen: v7x
topology: tpu7x:2x2x1
jax: 0.10.0
libtpu: 0.0.40
codegen_flags: <defaults>
</compile_context>

<pallas_src>
import functools

import numpy as np

import jax
import jax.numpy as jnp
from jax.experimental import pallas as pl
from jax.experimental.pallas import tpu as pltpu


# ---------------------------------------------------------------------------
# Fused TinyVGG kernel: B images per grid step, stacked along the M axis.
# ---------------------------------------------------------------------------
def _tinyvgg_kernel(
    x_ref,                                    # (B*(H+4), H*Cin) f32, padded rows
    w1_ref, b1_ref, w2_ref, b2_ref,
    w3_ref, b3_ref, w4_ref, b4_ref,
    g_ref, fcb_ref, m1_ref, m2_ref,
    out_ref,                                  # (B, KPAD) f32
    pad1_s, a2_s, pad2_s, pad3_s, a4_s, hp2_s,
    *, c1, c2,
):
    f32, bf16 = jnp.float32, jnp.bfloat16

    M1 = pad1_s.shape[0]          # B * (H + 4)
    M2 = pad2_s.shape[0]          # B * (H//2 + 2)
    r1 = M1 - 2                   # conv output rows, block-1 stack
    r2 = M2 - 2                   # conv output rows, block-2 stack
    nv1 = M2 - 1                  # vertical-pool rows, block 1
    nv2 = hp2_s.shape[0] - 1      # vertical-pool rows, block 2
    B = out_ref.shape[0]
    L1 = pad1_s.shape[1]
    L2 = pad3_s.shape[1]

    # Pad rows that the masked slice stores below never touch are re-zeroed
    # every step (no cross-step scratch state -> megacore / "parallel" safe).
    pad1_s[0:1, :] = jnp.zeros((1, L1), f32)
    pad1_s[M1 - 1:M1, :] = jnp.zeros((1, L1), f32)
    pad2_s[0:1, :] = jnp.zeros((1, L1), f32)
    pad3_s[0:1, :] = jnp.zeros((1, L2), f32)
    pad3_s[M2 - 1:M2, :] = jnp.zeros((1, L2), f32)

    def conv3x3(src_ref, w_ref, rows):
        """3x3 same-padded conv = 3 bf16 MXU matmuls on the whole padded
        row-stack (one per vertical tap), f32 accumulation."""
        acc = jnp.dot(src_ref[0:rows, :].astype(bf16), w_ref[0],
                      preferred_element_type=f32)
        acc += jnp.dot(src_ref[1:rows + 1, :].astype(bf16), w_ref[1],
                       preferred_element_type=f32)
        acc += jnp.dot(src_ref[2:rows + 2, :].astype(bf16), w_ref[2],
                       preferred_element_type=f32)
        return acc

    def hpool(v, ch):
        """Horizontal 2x max pool: compare lane group w with w+1 (results are
        only meaningful at even-w lane groups; odd groups are ignored because
        the consuming weights have zero rows there)."""
        v_sh = jnp.concatenate([v[:, ch:], v[:, :ch]], axis=1)
        return jnp.maximum(v, v_sh)

    # ---- block 1: conv-relu, conv-relu, 2x2 maxpool -------------------------
    s1 = conv3x3(x_ref, w1_ref, r1)
    pad1_s[1:M1 - 1, :] = jnp.maximum(s1 + b1_ref[...], 0.0) * m1_ref[...]

    s2 = conv3x3(pad1_s, w2_ref, r1)
    a2_s[...] = jnp.maximum(s2 + b2_ref[...], 0.0)
    v1 = jnp.maximum(a2_s[pl.ds(0, nv1, stride=2), :],
                     a2_s[pl.ds(1, nv1, stride=2), :])
    pad2_s[1:M2, :] = hpool(v1, c1) * m2_ref[0:nv1, :]

    # ---- block 2: conv-relu, conv-relu, 2x2 maxpool -------------------------
    s3 = conv3x3(pad2_s, w3_ref, r2)      # horizontal compaction folded into w3
    pad3_s[1:M2 - 1, :] = jnp.maximum(s3 + b3_ref[...], 0.0) * m2_ref[0:r2, :]

    s4 = conv3x3(pad3_s, w4_ref, r2)
    a4_s[...] = jnp.maximum(s4 + b4_ref[...], 0.0)
    v2 = jnp.maximum(a4_s[pl.ds(0, nv2, stride=2), :],
                     a4_s[pl.ds(1, nv2, stride=2), :])
    hp2_s[0:nv2, :] = hpool(v2, c2)

    # ---- classifier: flatten (NCHW order folded into g) + linear ------------
    acc = jnp.dot(hp2_s[pl.ds(0, B, stride=hp2_s.shape[0] // B), :].astype(bf16),
                  g_ref[0], preferred_element_type=f32)
    stride = hp2_s.shape[0] // B
    for h in range(1, g_ref.shape[0]):
        acc += jnp.dot(hp2_s[pl.ds(h, B, stride=stride), :].astype(bf16),
                       g_ref[h], preferred_element_type=f32)
    out_ref[...] = acc + fcb_ref[...]


# ---------------------------------------------------------------------------
# One-time (parameter-load time) conversion of torch-layout params into the
# matrices the fused kernel consumes.
# ---------------------------------------------------------------------------
def _conv_toeplitz(w, width):
    """Torch conv weight (Cout,Cin,3,3) -> (3, width*Cin, width*Cout)
    block-Toeplitz matrices (one per vertical tap; horizontal taps and
    horizontal zero padding folded in)."""
    cout, cin = w.shape[0], w.shape[1]
    t = np.zeros((3, width * cin, width * cout), np.float32)
    for ky in range(3):
        for kx in range(3):
            blk = w[:, :, ky, kx].T                       # (cin, cout)
            for wo in range(width):
                wi = wo + kx - 1
                if 0 <= wi < width:
                    t[ky, wi * cin:(wi + 1) * cin,
                      wo * cout:(wo + 1) * cout] = blk
    return t


def _bias_row(b, width):
    return np.tile(np.asarray(b, np.float32), width).reshape(1, -1)


def _hpool_select(width, ch):
    """0/1 compaction matrix: keeps the even-w lane groups of the horizontally
    max-pooled row (width*ch lanes -> (width//2)*ch lanes)."""
    sel = np.zeros((width * ch, (width // 2) * ch), np.float32)
    for wp in range(width // 2):
        for c in range(ch):
            sel[(2 * wp) * ch + c, wp * ch + c] = 1.0
    return sel


def _fc_blocks(fc_w, c2, hf, wf, kpad):
    """Per-pooled-row classifier blocks (hf, 2*wf*c2, kpad): rows indexed by the
    *uncompacted* horizontally-pooled lane layout (pooled value of (wp, c) lives
    at lane (2*wp)*c2 + c), nn.Flatten's NCHW ordering folded in, outputs padded
    to kpad lanes."""
    k = fc_w.shape[0]
    g = np.zeros((hf, 2 * wf * c2, kpad), np.float32)
    for h in range(hf):
        for wp in range(wf):
            for c in range(c2):
                g[h, (2 * wp) * c2 + c, :k] = fc_w[:, c * hf * wf + h * wf + wp]
    return g


_OPERAND_KEYS = ("w1", "b1", "w2", "b2", "w3", "b3", "w4", "b4", "g", "fcb")


def build_tinyvgg_operands(params, *, spatial, n_classes, kpad=128):
    s = spatial
    assert s % 4 == 0, "spatial size must be divisible by 4 (two 2x2 pools)"
    assert n_classes <= kpad

    w1 = np.asarray(params["c1_w"], np.float32)
    w2 = np.asarray(params["c2_w"], np.float32)
    w3 = np.asarray(params["c3_w"], np.float32)
    w4 = np.asarray(params["c4_w"], np.float32)
    fcw = np.asarray(params["fc_w"], np.float32)
    c1, c2 = w1.shape[0], w3.shape[0]

    # Fold the block-1 horizontal-pool compaction into conv3's Toeplitz weights.
    t3 = _conv_toeplitz(w3, s // 2)                       # (3,(s//2)*c1,(s//2)*c2)
    ssel = _hpool_select(s, c1)                           # (s*c1, (s//2)*c1)
    w3f = np.stack([ssel @ t3[ky] for ky in range(3)])    # (3, s*c1, (s//2)*c2)

    ops = {
        "w1": _conv_toeplitz(w1, s),
        "b1": _bias_row(params["c1_b"], s),
        "w2": _conv_toeplitz(w2, s),
        "b2": _bias_row(params["c2_b"], s),
        "w3": w3f,
        "b3": _bias_row(params["c3_b"], s // 2),
        "w4": _conv_toeplitz(w4, s // 2),
        "b4": _bias_row(params["c4_b"], s // 2),
        "g": _fc_blocks(fcw, c2, s // 4, s // 4, kpad),
    }
    fcb = np.zeros((1, kpad), np.float32)
    fcb[0, :n_classes] = np.asarray(params["fc_b"], np.float32)
    ops["fcb"] = fcb

    out = {}
    for k, v in ops.items():
        dt = jnp.bfloat16 if k in ("w1", "w2", "w3", "w4", "g") else jnp.float32
        out[k] = jnp.asarray(v, dtype=dt)
    return out


def _row_mask(n_rows, period, n_valid):
    loc = np.arange(n_rows) % period
    return (loc < n_valid).astype(np.float32).reshape(n_rows, 1)


def _pick_batch_tile(n):
    # Prefer big M (B*rows per matmul) but keep >= 2 grid steps so v7x's two
    # TensorCores both get work; fall back to one full-batch step.
    for b in (16, 8):
        if n % b == 0 and n // b >= 2:
            return b
    return n


# ---------------------------------------------------------------------------
# Forward pass wrapper: only per-call glue is packing NCHW into the lane-dense
# padded row-stack layout; everything else is the single fused pallas_call.
# ---------------------------------------------------------------------------
def tinyvgg_forward(x_nchw, ops, *, n_classes):
    n, cin, s, s2 = x_nchw.shape
    assert s == s2 and s % 4 == 0
    kpad = ops["fcb"].shape[1]
    c1 = ops["b1"].shape[1] // s
    c2 = ops["b3"].shape[1] // (s // 2)

    B = _pick_batch_tile(n)
    period1 = s + 4                 # per-image row period, block-1 stack
    period2 = s // 2 + 2            # per-image row period, block-2 stack
    M1 = B * period1
    M2 = B * period2

    # Lane-dense row layout: one padded image row per sublane row, (width x
    # channels) packed on the lane axis; 1 zero pad row above, 1 below, plus 2
    # dead rows per image so row periods stay uniform after each 2x2 pool.
    x_rows = jnp.transpose(x_nchw, (0, 2, 3, 1)).astype(jnp.float32)
    x_rows = x_rows.reshape(n, s, s * cin)
    x_pad = jnp.pad(x_rows, ((0, 0), (1, 3), (0, 0)))      # (n, s+4, s*cin)
    x2d = x_pad.reshape(n * period1, s * cin)

    # Valid-row masks (tiled per image), built once per batch-tile shape.
    m1 = jnp.asarray(_row_mask(M1 - 2, period1, s))
    m2 = jnp.asarray(_row_mask(M2 - 1, period2, s // 2))

    kernel = functools.partial(_tinyvgg_kernel, c1=c1, c2=c2)

    in_specs = [pl.BlockSpec((B * period1, s * cin), lambda i: (i, 0))]
    for k in _OPERAND_KEYS:
        nd = ops[k].ndim
        in_specs.append(pl.BlockSpec(ops[k].shape, lambda i, nd=nd: (0,) * nd))
    in_specs += [pl.BlockSpec(m1.shape, lambda i: (0, 0)),
                 pl.BlockSpec(m2.shape, lambda i: (0, 0))]

    out = pl.pallas_call(
        kernel,
        grid=(n // B,),
        in_specs=in_specs,
        out_specs=pl.BlockSpec((B, kpad), lambda i: (i, 0)),
        out_shape=jax.ShapeDtypeStruct((n, kpad), jnp.float32),
        scratch_shapes=[
            pltpu.VMEM((M1, s * c1), jnp.float32),               # pad1 (conv1 out)
            pltpu.VMEM((M1 - 2, s * c1), jnp.float32),           # conv2 activation
            pltpu.VMEM((M2, s * c1), jnp.float32),               # pad2 (pooled, uncompacted)
            pltpu.VMEM((M2, (s // 2) * c2), jnp.float32),        # pad3 (conv3 out)
            pltpu.VMEM((M2 - 2, (s // 2) * c2), jnp.float32),    # conv4 activation
            pltpu.VMEM((B * (s // 4 + 1), (s // 2) * c2), jnp.float32),  # pooled feats
        ],
        compiler_params=pltpu.CompilerParams(
            dimension_semantics=("parallel",),   # batch tiles split across TCs
            vmem_limit_bytes=32 * 1024 * 1024,   # valid on v5e/v6e/v7x
        ),
    )(x2d, *[ops[k] for k in _OPERAND_KEYS], m1, m2)

    return out[:, :n_classes]


# ---------------------------------------------------------------------------
# Parameter init (torch-default-ish uniform init) and pure-f32 XLA reference.
# ---------------------------------------------------------------------------
def init_params(key, input_size, c1, c2, output_size, linear_in):
    ks = jax.random.split(key, 10)

    def conv_init(kw, kb, cout, cin):
        bound = 1.0 / jnp.sqrt(cin * 9)
        w = jax.random.uniform(kw, (cout, cin, 3, 3), jnp.float32, -bound, bound)
        b = jax.random.uniform(kb, (cout,), jnp.float32, -bound, bound)
        return w, b

    p = {}
    p["c1_w"], p["c1_b"] = conv_init(ks[0], ks[1], c1, input_size)
    p["c2_w"], p["c2_b"] = conv_init(ks[2], ks[3], c1, c1)
    p["c3_w"], p["c3_b"] = conv_init(ks[4], ks[5], c2, c1)
    p["c4_w"], p["c4_b"] = conv_init(ks[6], ks[7], c2, c2)
    bound = 1.0 / jnp.sqrt(linear_in)
    p["fc_w"] = jax.random.uniform(ks[8], (output_size, linear_in),
                                   jnp.float32, -bound, bound)
    p["fc_b"] = jax.random.uniform(ks[9], (output_size,),
                                   jnp.float32, -bound, bound)
    return p


def tinyvgg_reference(x_nchw, params):
    x = jnp.transpose(x_nchw, (0, 2, 3, 1)).astype(jnp.float32)

    def conv(x, w, b):
        w_hwio = jnp.transpose(w, (2, 3, 1, 0))
        y = jax.lax.conv_general_dilated(
            x, w_hwio, window_strides=(1, 1), padding="SAME",
            dimension_numbers=("NHWC", "HWIO", "NHWC"))
        return jnp.maximum(y + b, 0.0)

    def pool(x):
        return jax.lax.reduce_window(x, -jnp.inf, jax.lax.max,
                                     (1, 2, 2, 1), (1, 2, 2, 1), "VALID")

    x = pool(conv(conv(x, params["c1_w"], params["c1_b"]),
                  params["c2_w"], params["c2_b"]))
    x = pool(conv(conv(x, params["c3_w"], params["c3_b"]),
                  params["c4_w"], params["c4_b"]))
    feat = jnp.transpose(x, (0, 3, 1, 2)).reshape(x.shape[0], -1)
    return feat @ params["fc_w"].T + params["fc_b"]


if __name__ == "__main__":
    # TinyVGG(name, input_size=3, first_hidden=8, second_hidden=8,
    #         output_size=4, first_hidden_linear_nodes=8*4*4)
    batch, in_ch, spatial = 16, 3, 16          # batch 16 -> B=8, grid=(2,)
    c1 = c2 = 8
    n_classes = 4
    linear_in = c2 * (spatial // 4) * (spatial // 4)      # 128

    key = jax.random.PRNGKey(0)
    kx, kp = jax.random.split(key)
    x = jax.random.normal(kx, (batch, in_ch, spatial, spatial), jnp.float32)
    params = init_params(kp, in_ch, c1, c2, n_classes, linear_in)

    ops = build_tinyvgg_operands(params, spatial=spatial, n_classes=n_classes)
    fwd = jax.jit(tinyvgg_forward, static_argnames=("n_classes",))
    logits = fwd(x, ops, n_classes=n_classes)
    jax.block_until_ready(logits)
    assert logits.shape == (batch, n_classes)

    # bf16 MXU operands (weights + activation LHS) -> loose tolerance vs the
    # pure-f32 XLA reference; pooling/selection paths are exact (no MXU).
    ref = tinyvgg_reference(x, params)
    err = float(jnp.max(jnp.abs(logits - ref)))
    assert err < 5e-2, f"kernel/reference mismatch: max abs err = {err}"
    print("KERNEL_OK")
</pallas_src>

<mosaic_0001>
module attributes {stable_mosaic.version = 11 : i64} {
  func.func @_tinyvgg_kernel(%arg0: i32, %arg1: memref<160x48xf32, #tpu.memory_space<vmem>>, %arg2: memref<3x48x128xbf16, #tpu.memory_space<vmem>>, %arg3: memref<1x128xf32, #tpu.memory_space<vmem>>, %arg4: memref<3x128x128xbf16, #tpu.memory_space<vmem>>, %arg5: memref<1x128xf32, #tpu.memory_space<vmem>>, %arg6: memref<3x128x64xbf16, #tpu.memory_space<vmem>>, %arg7: memref<1x64xf32, #tpu.memory_space<vmem>>, %arg8: memref<3x64x64xbf16, #tpu.memory_space<vmem>>, %arg9: memref<1x64xf32, #tpu.memory_space<vmem>>, %arg10: memref<4x64x128xbf16, #tpu.memory_space<vmem>>, %arg11: memref<1x128xf32, #tpu.memory_space<vmem>>, %arg12: memref<158x1xf32, #tpu.memory_space<vmem>>, %arg13: memref<79x1xf32, #tpu.memory_space<vmem>>, %arg14: memref<8x128xf32, #tpu.memory_space<vmem>>, %arg15: memref<160x128xf32, #tpu.memory_space<vmem>>, %arg16: memref<158x128xf32, #tpu.memory_space<vmem>>, %arg17: memref<80x128xf32, #tpu.memory_space<vmem>>, %arg18: memref<80x64xf32, #tpu.memory_space<vmem>>, %arg19: memref<78x64xf32, #tpu.memory_space<vmem>>, %arg20: memref<40x64xf32, #tpu.memory_space<vmem>>) attributes {dimension_semantics = [#tpu.dimension_semantics<parallel>], iteration_bounds = array<i64: 2>, scalar_prefetch = 0 : i64, scratch_operands = 6 : i64, tpu.core_type = #tpu.core_type<tc>, window_params = [{transform_indices = @transform_0, window_bounds = array<i64: 160, 48>}, {pipeline_mode = #tpu.pipeline_mode<synchronous>, transform_indices = @transform_1, window_bounds = array<i64: 3, 48, 128>}, {pipeline_mode = #tpu.pipeline_mode<synchronous>, transform_indices = @transform_2, window_bounds = array<i64: 1, 128>}, {pipeline_mode = #tpu.pipeline_mode<synchronous>, transform_indices = @transform_3, window_bounds = array<i64: 3, 128, 128>}, {pipeline_mode = #tpu.pipeline_mode<synchronous>, transform_indices = @transform_4, window_bounds = array<i64: 1, 128>}, {pipeline_mode = #tpu.pipeline_mode<synchronous>, transform_indices = @transform_5, window_bounds = array<i64: 3, 128, 64>}, {pipeline_mode = #tpu.pipeline_mode<synchronous>, transform_indices = @transform_6, window_bounds = array<i64: 1, 64>}, {pipeline_mode = #tpu.pipeline_mode<synchronous>, transform_indices = @transform_7, window_bounds = array<i64: 3, 64, 64>}, {pipeline_mode = #tpu.pipeline_mode<synchronous>, transform_indices = @transform_8, window_bounds = array<i64: 1, 64>}, {pipeline_mode = #tpu.pipeline_mode<synchronous>, transform_indices = @transform_9, window_bounds = array<i64: 4, 64, 128>}, {pipeline_mode = #tpu.pipeline_mode<synchronous>, transform_indices = @transform_10, window_bounds = array<i64: 1, 128>}, {pipeline_mode = #tpu.pipeline_mode<synchronous>, transform_indices = @transform_11, window_bounds = array<i64: 158, 1>}, {pipeline_mode = #tpu.pipeline_mode<synchronous>, transform_indices = @transform_12, window_bounds = array<i64: 79, 1>}, {transform_indices = @transform_13, window_bounds = array<i64: 8, 128>}]} {
    %cst = arith.constant 0.000000e+00 : f32
    %0 = vector.broadcast %cst : f32 to vector<1x128xf32>
    %c0 = arith.constant 0 : index
    %c0_0 = arith.constant 0 : index
    %1 = vector.load %arg15[%c0, %c0_0] : memref<160x128xf32, #tpu.memory_space<vmem>>, vector<1x128xf32>
    tpu.vector_store %arg15[%c0, %c0_0], %0 {strides = array<i32>} : memref<160x128xf32, #tpu.memory_space<vmem>>, vector<1x128xf32>,
    %cst_1 = arith.constant 0.000000e+00 : f32
    %2 = vector.broadcast %cst_1 : f32 to vector<1x128xf32>
    %c159 = arith.constant 159 : index
    %c0_2 = arith.constant 0 : index
    %3 = vector.load %arg15[%c159, %c0_2] : memref<160x128xf32, #tpu.memory_space<vmem>>, vector<1x128xf32>
    tpu.vector_store %arg15[%c159, %c0_2], %2 {strides = array<i32>} : memref<160x128xf32, #tpu.memory_space<vmem>>, vector<1x128xf32>,
    %cst_3 = arith.constant 0.000000e+00 : f32
    %4 = vector.broadcast %cst_3 : f32 to vector<1x128xf32>
    %c0_4 = arith.constant 0 : index
    %c0_5 = arith.constant 0 : index
    %5 = vector.load %arg17[%c0_4, %c0_5] : memref<80x128xf32, #tpu.memory_space<vmem>>, vector<1x128xf32>
    tpu.vector_store %arg17[%c0_4, %c0_5], %4 {strides = array<i32>} : memref<80x128xf32, #tpu.memory_space<vmem>>, vector<1x128xf32>,
    %cst_6 = arith.constant 0.000000e+00 : f32
    %6 = vector.broadcast %cst_6 : f32 to vector<1x64xf32>
    %c0_7 = arith.constant 0 : index
    %c0_8 = arith.constant 0 : index
    %7 = vector.load %arg18[%c0_7, %c0_8] : memref<80x64xf32, #tpu.memory_space<vmem>>, vector<1x64xf32>
    tpu.vector_store %arg18[%c0_7, %c0_8], %6 {strides = array<i32>} : memref<80x64xf32, #tpu.memory_space<vmem>>, vector<1x64xf32>,
    %cst_9 = arith.constant 0.000000e+00 : f32
    %8 = vector.broadcast %cst_9 : f32 to vector<1x64xf32>
    %c79 = arith.constant 79 : index
    %c0_10 = arith.constant 0 : index
    %9 = vector.load %arg18[%c79, %c0_10] : memref<80x64xf32, #tpu.memory_space<vmem>>, vector<1x64xf32>
    tpu.vector_store %arg18[%c79, %c0_10], %8 {strides = array<i32>} : memref<80x64xf32, #tpu.memory_space<vmem>>, vector<1x64xf32>,
    %c0_11 = arith.constant 0 : index
    %c0_12 = arith.constant 0 : index
    %10 = vector.load %arg1[%c0_11, %c0_12] : memref<160x48xf32, #tpu.memory_space<vmem>>, vector<158x48xf32>
    %11 = arith.truncf %10 : vector<158x48xf32> to vector<158x48xbf16>
    %c0_13 = arith.constant 0 : index
    %c0_14 = arith.constant 0 : index
    %c0_15 = arith.constant 0 : index
    %12 = vector.load %arg2[%c0_13, %c0_14, %c0_15] : memref<3x48x128xbf16, #tpu.memory_space<vmem>>, vector<1x48x128xbf16>
    %13 = vector.shape_cast %12 : vector<1x48x128xbf16> to vector<48x128xbf16>
    %cst_16 = arith.constant dense<0.000000e+00> : vector<158x128xf32>
    %14 = tpu.matmul %11, %13, %cst_16 {dimension_numbers = #tpu.dot_dimension_numbers<[1], [0], [0], [1], [0, 0, 1, 1], [], []>} : vector<158x48xbf16>, vector<48x128xbf16>, vector<158x128xf32> -> vector<158x128xf32>
    %c1 = arith.constant 1 : index
    %c0_17 = arith.constant 0 : index
    %15 = vector.load %arg1[%c1, %c0_17] : memref<160x48xf32, #tpu.memory_space<vmem>>, vector<158x48xf32>
    %16 = arith.truncf %15 : vector<158x48xf32> to vector<158x48xbf16>
    %c1_18 = arith.constant 1 : index
    %c0_19 = arith.constant 0 : index
    %c0_20 = arith.constant 0 : index
    %17 = vector.load %arg2[%c1_18, %c0_19, %c0_20] : memref<3x48x128xbf16, #tpu.memory_space<vmem>>, vector<1x48x128xbf16>
    %18 = vector.shape_cast %17 : vector<1x48x128xbf16> to vector<48x128xbf16>
    %cst_21 = arith.constant dense<0.000000e+00> : vector<158x128xf32>
    %19 = tpu.matmul %16, %18, %cst_21 {dimension_numbers = #tpu.dot_dimension_numbers<[1], [0], [0], [1], [0, 0, 1, 1], [], []>} : vector<158x48xbf16>, vector<48x128xbf16>, vector<158x128xf32> -> vector<158x128xf32>
    %20 = arith.addf %14, %19 : vector<158x128xf32>
    %c2 = arith.constant 2 : index
    %c0_22 = arith.constant 0 : index
    %21 = vector.load %arg1[%c2, %c0_22] : memref<160x48xf32, #tpu.memory_space<vmem>>, vector<158x48xf32>
    %22 = arith.truncf %21 : vector<158x48xf32> to vector<158x48xbf16>
    %c2_23 = arith.constant 2 : index
    %c0_24 = arith.constant 0 : index
    %c0_25 = arith.constant 0 : index
    %23 = vector.load %arg2[%c2_23, %c0_24, %c0_25] : memref<3x48x128xbf16, #tpu.memory_space<vmem>>, vector<1x48x128xbf16>
    %24 = vector.shape_cast %23 : vector<1x48x128xbf16> to vector<48x128xbf16>
    %cst_26 = arith.constant dense<0.000000e+00> : vector<158x128xf32>
    %25 = tpu.matmul %22, %24, %cst_26 {dimension_numbers = #tpu.dot_dimension_numbers<[1], [0], [0], [1], [0, 0, 1, 1], [], []>} : vector<158x48xbf16>, vector<48x128xbf16>, vector<158x128xf32> -> vector<158x128xf32>
    %26 = arith.addf %20, %25 : vector<158x128xf32>
    %c0_27 = arith.constant 0 : index
    %c0_28 = arith.constant 0 : index
    %27 = vector.load %arg3[%c0_27, %c0_28] : memref<1x128xf32, #tpu.memory_space<vmem>>, vector<1x128xf32>
    %28 = vector.broadcast %27 : vector<1x128xf32> to vector<158x128xf32>
    %29 = arith.addf %26, %28 : vector<158x128xf32>
    %cst_29 = arith.constant 0.000000e+00 : f32
    %30 = vector.broadcast %cst_29 : f32 to vector<158x128xf32>
    %31 = arith.maximumf %29, %30 : vector<158x128xf32>
    %c0_30 = arith.constant 0 : index
    %c0_31 = arith.constant 0 : index
    %32 = vector.load %arg12[%c0_30, %c0_31] : memref<158x1xf32, #tpu.memory_space<vmem>>, vector<158x1xf32>
    %33 = vector.broadcast %32 : vector<158x1xf32> to vector<158x128xf32>
    %34 = arith.mulf %31, %33 : vector<158x128xf32>
    %c1_32 = arith.constant 1 : index
    %c0_33 = arith.constant 0 : index
    %35 = vector.load %arg15[%c1_32, %c0_33] : memref<160x128xf32, #tpu.memory_space<vmem>>, vector<158x128xf32>
    tpu.vector_store %arg15[%c1_32, %c0_33], %34 {strides = array<i32>} : memref<160x128xf32, #tpu.memory_space<vmem>>, vector<158x128xf32>,
    %c0_34 = arith.constant 0 : index
    %c0_35 = arith.constant 0 : index
    %36 = vector.load %arg15[%c0_34, %c0_35] : memref<160x128xf32, #tpu.memory_space<vmem>>, vector<158x128xf32>
    %37 = arith.truncf %36 : vector<158x128xf32> to vector<158x128xbf16>
    %c0_36 = arith.constant 0 : index
    %c0_37 = arith.constant 0 : index
    %c0_38 = arith.constant 0 : index
    %38 = vector.load %arg4[%c0_36, %c0_37, %c0_38] : memref<3x128x128xbf16, #tpu.memory_space<vmem>>, vector<1x128x128xbf16>
    %39 = vector.shape_cast %38 : vector<1x128x128xbf16> to vector<128x128xbf16>
    %cst_39 = arith.constant dense<0.000000e+00> : vector<158x128xf32>
    %40 = tpu.matmul %37, %39, %cst_39 {dimension_numbers = #tpu.dot_dimension_numbers<[1], [0], [0], [1], [0, 0, 1, 1], [], []>} : vector<158x128xbf16>, vector<128x128xbf16>, vector<158x128xf32> -> vector<158x128xf32>
    %c1_40 = arith.constant 1 : index
    %c0_41 = arith.constant 0 : index
    %41 = vector.load %arg15[%c1_40, %c0_41] : memref<160x128xf32, #tpu.memory_space<vmem>>, vector<158x128xf32>
    %42 = arith.truncf %41 : vector<158x128xf32> to vector<158x128xbf16>
    %c1_42 = arith.constant 1 : index
    %c0_43 = arith.constant 0 : index
    %c0_44 = arith.constant 0 : index
    %43 = vector.load %arg4[%c1_42, %c0_43, %c0_44] : memref<3x128x128xbf16, #tpu.memory_space<vmem>>, vector<1x128x128xbf16>
    %44 = vector.shape_cast %43 : vector<1x128x128xbf16> to vector<128x128xbf16>
    %cst_45 = arith.constant dense<0.000000e+00> : vector<158x128xf32>
    %45 = tpu.matmul %42, %44, %cst_45 {dimension_numbers = #tpu.dot_dimension_numbers<[1], [0], [0], [1], [0, 0, 1, 1], [], []>} : vector<158x128xbf16>, vector<128x128xbf16>, vector<158x128xf32> -> vector<158x128xf32>
    %46 = arith.addf %40, %45 : vector<158x128xf32>
    %c2_46 = arith.constant 2 : index
    %c0_47 = arith.constant 0 : index
    %47 = vector.load %arg15[%c2_46, %c0_47] : memref<160x128xf32, #tpu.memory_space<vmem>>, vector<158x128xf32>
    %48 = arith.truncf %47 : vector<158x128xf32> to vector<158x128xbf16>
    %c2_48 = arith.constant 2 : index
    %c0_49 = arith.constant 0 : index
    %c0_50 = arith.constant 0 : index
    %49 = vector.load %arg4[%c2_48, %c0_49, %c0_50] : memref<3x128x128xbf16, #tpu.memory_space<vmem>>, vector<1x128x128xbf16>
    %50 = vector.shape_cast %49 : vector<1x128x128xbf16> to vector<128x128xbf16>
    %cst_51 = arith.constant dense<0.000000e+00> : vector<158x128xf32>
    %51 = tpu.matmul %48, %50, %cst_51 {dimension_numbers = #tpu.dot_dimension_numbers<[1], [0], [0], [1], [0, 0, 1, 1], [], []>} : vector<158x128xbf16>, vector<128x128xbf16>, vector<158x128xf32> -> vector<158x128xf32>
    %52 = arith.addf %46, %51 : vector<158x128xf32>
    %c0_52 = arith.constant 0 : index
    %c0_53 = arith.constant 0 : index
    %53 = vector.load %arg5[%c0_52, %c0_53] : memref<1x128xf32, #tpu.memory_space<vmem>>, vector<1x128xf32>
    %54 = vector.broadcast %53 : vector<1x128xf32> to vector<158x128xf32>
    %55 = arith.addf %52, %54 : vector<158x128xf32>
    %cst_54 = arith.constant 0.000000e+00 : f32
    %56 = vector.broadcast %cst_54 : f32 to vector<158x128xf32>
    %57 = arith.maximumf %55, %56 : vector<158x128xf32>
    %c0_55 = arith.constant 0 : index
    %c0_56 = arith.constant 0 : index
    %58 = vector.load %arg16[%c0_55, %c0_56] : memref<158x128xf32, #tpu.memory_space<vmem>>, vector<158x128xf32>
    tpu.vector_store %arg16[%c0_55, %c0_56], %57 {strides = array<i32>} : memref<158x128xf32, #tpu.memory_space<vmem>>, vector<158x128xf32>,
    %c0_57 = arith.constant 0 : index
    %c0_58 = arith.constant 0 : index
    %59 = tpu.strided_load %arg16[%c0_57, %c0_58] {strides = array<i32: 2, 1>} : memref<158x128xf32, #tpu.memory_space<vmem>>, vector<79x128xf32>
    %c1_59 = arith.constant 1 : index
    %c0_60 = arith.constant 0 : index
    %60 = tpu.strided_load %arg16[%c1_59, %c0_60] {strides = array<i32: 2, 1>} : memref<158x128xf32, #tpu.memory_space<vmem>>, vector<79x128xf32>
    %61 = arith.maximumf %59, %60 : vector<79x128xf32>
    %62 = vector.extract_strided_slice %61 {offsets = [0, 8], sizes = [79, 120], strides = [1, 1]} : vector<79x128xf32> to vector<79x120xf32>
    %63 = vector.extract_strided_slice %61 {offsets = [0, 0], sizes = [79, 8], strides = [1, 1]} : vector<79x128xf32> to vector<79x8xf32>
    %64 = tpu.concatenate %62, %63 in 1 : vector<79x120xf32>, vector<79x8xf32> -> vector<79x128xf32>
    %65 = arith.maximumf %61, %64 : vector<79x128xf32>
    %c0_61 = arith.constant 0 : index
    %c0_62 = arith.constant 0 : index
    %66 = vector.load %arg13[%c0_61, %c0_62] : memref<79x1xf32, #tpu.memory_space<vmem>>, vector<79x1xf32>
    %67 = vector.broadcast %66 : vector<79x1xf32> to vector<79x128xf32>
    %68 = arith.mulf %65, %67 : vector<79x128xf32>
    %c1_63 = arith.constant 1 : index
    %c0_64 = arith.constant 0 : index
    %69 = vector.load %arg17[%c1_63, %c0_64] : memref<80x128xf32, #tpu.memory_space<vmem>>, vector<79x128xf32>
    tpu.vector_store %arg17[%c1_63, %c0_64], %68 {strides = array<i32>} : memref<80x128xf32, #tpu.memory_space<vmem>>, vector<79x128xf32>,
    %c0_65 = arith.constant 0 : index
    %c0_66 = arith.constant 0 : index
    %70 = vector.load %arg17[%c0_65, %c0_66] : memref<80x128xf32, #tpu.memory_space<vmem>>, vector<78x128xf32>
    %71 = arith.truncf %70 : vector<78x128xf32> to vector<78x128xbf16>
    %c0_67 = arith.constant 0 : index
    %c0_68 = arith.constant 0 : index
    %c0_69 = arith.constant 0 : index
    %72 = vector.load %arg6[%c0_67, %c0_68, %c0_69] : memref<3x128x64xbf16, #tpu.memory_space<vmem>>, vector<1x128x64xbf16>
    %73 = vector.shape_cast %72 : vector<1x128x64xbf16> to vector<128x64xbf16>
    %cst_70 = arith.constant dense<0.000000e+00> : vector<78x64xf32>
    %74 = tpu.matmul %71, %73, %cst_70 {dimension_numbers = #tpu.dot_dimension_numbers<[1], [0], [0], [1], [0, 0, 1, 1], [], []>} : vector<78x128xbf16>, vector<128x64xbf16>, vector<78x64xf32> -> vector<78x64xf32>
    %c1_71 = arith.constant 1 : index
    %c0_72 = arith.constant 0 : index
    %75 = vector.load %arg17[%c1_71, %c0_72] : memref<80x128xf32, #tpu.memory_space<vmem>>, vector<78x128xf32>
    %76 = arith.truncf %75 : vector<78x128xf32> to vector<78x128xbf16>
    %c1_73 = arith.constant 1 : index
    %c0_74 = arith.constant 0 : index
    %c0_75 = arith.constant 0 : index
    %77 = vector.load %arg6[%c1_73, %c0_74, %c0_75] : memref<3x128x64xbf16, #tpu.memory_space<vmem>>, vector<1x128x64xbf16>
    %78 = vector.shape_cast %77 : vector<1x128x64xbf16> to vector<128x64xbf16>
    %cst_76 = arith.constant dense<0.000000e+00> : vector<78x64xf32>
    %79 = tpu.matmul %76, %78, %cst_76 {dimension_numbers = #tpu.dot_dimension_numbers<[1], [0], [0], [1], [0, 0, 1, 1], [], []>} : vector<78x128xbf16>, vector<128x64xbf16>, vector<78x64xf32> -> vector<78x64xf32>
    %80 = arith.addf %74, %79 : vector<78x64xf32>
    %c2_77 = arith.constant 2 : index
    %c0_78 = arith.constant 0 : index
    %81 = vector.load %arg17[%c2_77, %c0_78] : memref<80x128xf32, #tpu.memory_space<vmem>>, vector<78x128xf32>
    %82 = arith.truncf %81 : vector<78x128xf32> to vector<78x128xbf16>
    %c2_79 = arith.constant 2 : index
    %c0_80 = arith.constant 0 : index
    %c0_81 = arith.constant 0 : index
    %83 = vector.load %arg6[%c2_79, %c0_80, %c0_81] : memref<3x128x64xbf16, #tpu.memory_space<vmem>>, vector<1x128x64xbf16>
    %84 = vector.shape_cast %83 : vector<1x128x64xbf16> to vector<128x64xbf16>
    %cst_82 = arith.constant dense<0.000000e+00> : vector<78x64xf32>
    %85 = tpu.matmul %82, %84, %cst_82 {dimension_numbers = #tpu.dot_dimension_numbers<[1], [0], [0], [1], [0, 0, 1, 1], [], []>} : vector<78x128xbf16>, vector<128x64xbf16>, vector<78x64xf32> -> vector<78x64xf32>
    %86 = arith.addf %80, %85 : vector<78x64xf32>
    %c0_83 = arith.constant 0 : index
    %c0_84 = arith.constant 0 : index
    %87 = vector.load %arg7[%c0_83, %c0_84] : memref<1x64xf32, #tpu.memory_space<vmem>>, vector<1x64xf32>
    %88 = vector.broadcast %87 : vector<1x64xf32> to vector<78x64xf32>
    %89 = arith.addf %86, %88 : vector<78x64xf32>
    %cst_85 = arith.constant 0.000000e+00 : f32
    %90 = vector.broadcast %cst_85 : f32 to vector<78x64xf32>
    %91 = arith.maximumf %89, %90 : vector<78x64xf32>
    %c0_86 = arith.constant 0 : index
    %c0_87 = arith.constant 0 : index
    %92 = vector.load %arg13[%c0_86, %c0_87] : memref<79x1xf32, #tpu.memory_space<vmem>>, vector<78x1xf32>
    %93 = vector.broadcast %92 : vector<78x1xf32> to vector<78x64xf32>
    %94 = arith.mulf %91, %93 : vector<78x64xf32>
    %c1_88 = arith.constant 1 : index
    %c0_89 = arith.constant 0 : index
    %95 = vector.load %arg18[%c1_88, %c0_89] : memref<80x64xf32, #tpu.memory_space<vmem>>, vector<78x64xf32>
    tpu.vector_store %arg18[%c1_88, %c0_89], %94 {strides = array<i32>} : memref<80x64xf32, #tpu.memory_space<vmem>>, vector<78x64xf32>,
    %c0_90 = arith.constant 0 : index
    %c0_91 = arith.constant 0 : index
    %96 = vector.load %arg18[%c0_90, %c0_91] : memref<80x64xf32, #tpu.memory_space<vmem>>, vector<78x64xf32>
    %97 = arith.truncf %96 : vector<78x64xf32> to vector<78x64xbf16>
    %c0_92 = arith.constant 0 : index
    %c0_93 = arith.constant 0 : index
    %c0_94 = arith.constant 0 : index
    %98 = vector.load %arg8[%c0_92, %c0_93, %c0_94] : memref<3x64x64xbf16, #tpu.memory_space<vmem>>, vector<1x64x64xbf16>
    %99 = vector.shape_cast %98 : vector<1x64x64xbf16> to vector<64x64xbf16>
    %cst_95 = arith.constant dense<0.000000e+00> : vector<78x64xf32>
    %100 = tpu.matmul %97, %99, %cst_95 {dimension_numbers = #tpu.dot_dimension_numbers<[1], [0], [0], [1], [0, 0, 1, 1], [], []>} : vector<78x64xbf16>, vector<64x64xbf16>, vector<78x64xf32> -> vector<78x64xf32>
    %c1_96 = arith.constant 1 : index
    %c0_97 = arith.constant 0 : index
    %101 = vector.load %arg18[%c1_96, %c0_97] : memref<80x64xf32, #tpu.memory_space<vmem>>, vector<78x64xf32>
    %102 = arith.truncf %101 : vector<78x64xf32> to vector<78x64xbf16>
    %c1_98 = arith.constant 1 : index
    %c0_99 = arith.constant 0 : index
    %c0_100 = arith.constant 0 : index
    %103 = vector.load %arg8[%c1_98, %c0_99, %c0_100] : memref<3x64x64xbf16, #tpu.memory_space<vmem>>, vector<1x64x64xbf16>
    %104 = vector.shape_cast %103 : vector<1x64x64xbf16> to vector<64x64xbf16>
    %cst_101 = arith.constant dense<0.000000e+00> : vector<78x64xf32>
    %105 = tpu.matmul %102, %104, %cst_101 {dimension_numbers = #tpu.dot_dimension_numbers<[1], [0], [0], [1], [0, 0, 1, 1], [], []>} : vector<78x64xbf16>, vector<64x64xbf16>, vector<78x64xf32> -> vector<78x64xf32>
    %106 = arith.addf %100, %105 : vector<78x64xf32>
    %c2_102 = arith.constant 2 : index
    %c0_103 = arith.constant 0 : index
    %107 = vector.load %arg18[%c2_102, %c0_103] : memref<80x64xf32, #tpu.memory_space<vmem>>, vector<78x64xf32>
    %108 = arith.truncf %107 : vector<78x64xf32> to vector<78x64xbf16>
    %c2_104 = arith.constant 2 : index
    %c0_105 = arith.constant 0 : index
    %c0_106 = arith.constant 0 : index
    %109 = vector.load %arg8[%c2_104, %c0_105, %c0_106] : memref<3x64x64xbf16, #tpu.memory_space<vmem>>, vector<1x64x64xbf16>
    %110 = vector.shape_cast %109 : vector<1x64x64xbf16> to vector<64x64xbf16>
    %cst_107 = arith.constant dense<0.000000e+00> : vector<78x64xf32>
    %111 = tpu.matmul %108, %110, %cst_107 {dimension_numbers = #tpu.dot_dimension_numbers<[1], [0], [0], [1], [0, 0, 1, 1], [], []>} : vector<78x64xbf16>, vector<64x64xbf16>, vector<78x64xf32> -> vector<78x64xf32>
    %112 = arith.addf %106, %111 : vector<78x64xf32>
    %c0_108 = arith.constant 0 : index
    %c0_109 = arith.constant 0 : index
    %113 = vector.load %arg9[%c0_108, %c0_109] : memref<1x64xf32, #tpu.memory_space<vmem>>, vector<1x64xf32>
    %114 = vector.broadcast %113 : vector<1x64xf32> to vector<78x64xf32>
    %115 = arith.addf %112, %114 : vector<78x64xf32>
    %cst_110 = arith.constant 0.000000e+00 : f32
    %116 = vector.broadcast %cst_110 : f32 to vector<78x64xf32>
    %117 = arith.maximumf %115, %116 : vector<78x64xf32>
    %c0_111 = arith.constant 0 : index
    %c0_112 = arith.constant 0 : index
    %118 = vector.load %arg19[%c0_111, %c0_112] : memref<78x64xf32, #tpu.memory_space<vmem>>, vector<78x64xf32>
    tpu.vector_store %arg19[%c0_111, %c0_112], %117 {strides = array<i32>} : memref<78x64xf32, #tpu.memory_space<vmem>>, vector<78x64xf32>,
    %c0_113 = arith.constant 0 : index
    %c0_114 = arith.constant 0 : index
    %119 = tpu.strided_load %arg19[%c0_113, %c0_114] {strides = array<i32: 2, 1>} : memref<78x64xf32, #tpu.memory_space<vmem>>, vector<39x64xf32>
    %c1_115 = arith.constant 1 : index
    %c0_116 = arith.constant 0 : index
    %120 = tpu.strided_load %arg19[%c1_115, %c0_116] {strides = array<i32: 2, 1>} : memref<78x64xf32, #tpu.memory_space<vmem>>, vector<39x64xf32>
    %121 = arith.maximumf %119, %120 : vector<39x64xf32>
    %122 = vector.extract_strided_slice %121 {offsets = [0, 8], sizes = [39, 56], strides = [1, 1]} : vector<39x64xf32> to vector<39x56xf32>
    %123 = vector.extract_strided_slice %121 {offsets = [0, 0], sizes = [39, 8], strides = [1, 1]} : vector<39x64xf32> to vector<39x8xf32>
    %124 = tpu.concatenate %122, %123 in 1 : vector<39x56xf32>, vector<39x8xf32> -> vector<39x64xf32>
    %125 = arith.maximumf %121, %124 : vector<39x64xf32>
    %c0_117 = arith.constant 0 : index
    %c0_118 = arith.constant 0 : index
    %126 = vector.load %arg20[%c0_117, %c0_118] : memref<40x64xf32, #tpu.memory_space<vmem>>, vector<39x64xf32>
    tpu.vector_store %arg20[%c0_117, %c0_118], %125 {strides = array<i32>} : memref<40x64xf32, #tpu.memory_space<vmem>>, vector<39x64xf32>,
    %c0_119 = arith.constant 0 : index
    %c0_120 = arith.constant 0 : index
    %127 = tpu.strided_load %arg20[%c0_119, %c0_120] {strides = array<i32: 5, 1>} : memref<40x64xf32, #tpu.memory_space<vmem>>, vector<8x64xf32>
    %128 = arith.truncf %127 : vector<8x64xf32> to vector<8x64xbf16>
    %c0_121 = arith.constant 0 : index
    %c0_122 = arith.constant 0 : index
    %c0_123 = arith.constant 0 : index
    %129 = vector.load %arg10[%c0_121, %c0_122, %c0_123] : memref<4x64x128xbf16, #tpu.memory_space<vmem>>, vector<1x64x128xbf16>
    %130 = vector.shape_cast %129 : vector<1x64x128xbf16> to vector<64x128xbf16>
    %cst_124 = arith.constant dense<0.000000e+00> : vector<8x128xf32>
    %131 = tpu.matmul %128, %130, %cst_124 {dimension_numbers = #tpu.dot_dimension_numbers<[1], [0], [0], [1], [0, 0, 1, 1], [], []>} : vector<8x64xbf16>, vector<64x128xbf16>, vector<8x128xf32> -> vector<8x128xf32>
    %c1_125 = arith.constant 1 : index
    %c0_126 = arith.constant 0 : index
    %132 = tpu.strided_load %arg20[%c1_125, %c0_126] {strides = array<i32: 5, 1>} : memref<40x64xf32, #tpu.memory_space<vmem>>, vector<8x64xf32>
    %133 = arith.truncf %132 : vector<8x64xf32> to vector<8x64xbf16>
    %c1_127 = arith.constant 1 : index
    %c0_128 = arith.constant 0 : index
    %c0_129 = arith.constant 0 : index
    %134 = vector.load %arg10[%c1_127, %c0_128, %c0_129] : memref<4x64x128xbf16, #tpu.memory_space<vmem>>, vector<1x64x128xbf16>
    %135 = vector.shape_cast %134 : vector<1x64x128xbf16> to vector<64x128xbf16>
    %cst_130 = arith.constant dense<0.000000e+00> : vector<8x128xf32>
    %136 = tpu.matmul %133, %135, %cst_130 {dimension_numbers = #tpu.dot_dimension_numbers<[1], [0], [0], [1], [0, 0, 1, 1], [], []>} : vector<8x64xbf16>, vector<64x128xbf16>, vector<8x128xf32> -> vector<8x128xf32>
    %137 = arith.addf %131, %136 : vector<8x128xf32>
    %c2_131 = arith.constant 2 : index
    %c0_132 = arith.constant 0 : index
    %138 = tpu.strided_load %arg20[%c2_131, %c0_132] {strides = array<i32: 5, 1>} : memref<40x64xf32, #tpu.memory_space<vmem>>, vector<8x64xf32>
    %139 = arith.truncf %138 : vector<8x64xf32> to vector<8x64xbf16>
    %c2_133 = arith.constant 2 : index
    %c0_134 = arith.constant 0 : index
    %c0_135 = arith.constant 0 : index
    %140 = vector.load %arg10[%c2_133, %c0_134, %c0_135] : memref<4x64x128xbf16, #tpu.memory_space<vmem>>, vector<1x64x128xbf16>
    %141 = vector.shape_cast %140 : vector<1x64x128xbf16> to vector<64x128xbf16>
    %cst_136 = arith.constant dense<0.000000e+00> : vector<8x128xf32>
    %142 = tpu.matmul %139, %141, %cst_136 {dimension_numbers = #tpu.dot_dimension_numbers<[1], [0], [0], [1], [0, 0, 1, 1], [], []>} : vector<8x64xbf16>, vector<64x128xbf16>, vector<8x128xf32> -> vector<8x128xf32>
    %143 = arith.addf %137, %142 : vector<8x128xf32>
    %c3 = arith.constant 3 : index
    %c0_137 = arith.constant 0 : index
    %144 = tpu.strided_load %arg20[%c3, %c0_137] {strides = array<i32: 5, 1>} : memref<40x64xf32, #tpu.memory_space<vmem>>, vector<8x64xf32>
    %145 = arith.truncf %144 : vector<8x64xf32> to vector<8x64xbf16>
    %c3_138 = arith.constant 3 : index
    %c0_139 = arith.constant 0 : index
    %c0_140 = arith.constant 0 : index
    %146 = vector.load %arg10[%c3_138, %c0_139, %c0_140] : memref<4x64x128xbf16, #tpu.memory_space<vmem>>, vector<1x64x128xbf16>
    %147 = vector.shape_cast %146 : vector<1x64x128xbf16> to vector<64x128xbf16>
    %cst_141 = arith.constant dense<0.000000e+00> : vector<8x128xf32>
    %148 = tpu.matmul %145, %147, %cst_141 {dimension_numbers = #tpu.dot_dimension_numbers<[1], [0], [0], [1], [0, 0, 1, 1], [], []>} : vector<8x64xbf16>, vector<64x128xbf16>, vector<8x128xf32> -> vector<8x128xf32>
    %149 = arith.addf %143, %148 : vector<8x128xf32>
    %c0_142 = arith.constant 0 : index
    %c0_143 = arith.constant 0 : index
    %150 = vector.load %arg11[%c0_142, %c0_143] : memref<1x128xf32, #tpu.memory_space<vmem>>, vector<1x128xf32>
    %151 = vector.broadcast %150 : vector<1x128xf32> to vector<8x128xf32>
    %152 = arith.addf %149, %151 : vector<8x128xf32>
    %c0_144 = arith.constant 0 : index
    %c0_145 = arith.constant 0 : index
    %153 = vector.load %arg14[%c0_144, %c0_145] : memref<8x128xf32, #tpu.memory_space<vmem>>, vector<8x128xf32>
    tpu.vector_store %arg14[%c0_144, %c0_145], %152 {strides = array<i32>} : memref<8x128xf32, #tpu.memory_space<vmem>>, vector<8x128xf32>,
    return
  }
  func.func @transform_0(%arg0: i32) -> (i32, i32) {
    %c0_i32 = arith.constant 0 : i32
    %c0_i32_0 = arith.constant 0 : i32
    return %arg0, %c0_i32 : i32, i32
  }
  func.func @transform_1(%arg0: i32) -> (i32, i32, i32) {
    %c0_i32 = arith.constant 0 : i32
    %c0_i32_0 = arith.constant 0 : i32
    %c0_i32_1 = arith.constant 0 : i32
    %c0_i32_2 = arith.constant 0 : i32
    return %c0_i32, %c0_i32_0, %c0_i32_1 : i32, i32, i32
  }
  func.func @transform_2(%arg0: i32) -> (i32, i32) {
    %c0_i32 = arith.constant 0 : i32
    %c0_i32_0 = arith.constant 0 : i32
    %c0_i32_1 = arith.constant 0 : i32
    return %c0_i32, %c0_i32_0 : i32, i32
  }
  func.func @transform_3(%arg0: i32) -> (i32, i32, i32) {
    %c0_i32 = arith.constant 0 : i32
    %c0_i32_0 = arith.constant 0 : i32
    %c0_i32_1 = arith.constant 0 : i32
    %c0_i32_2 = arith.constant 0 : i32
    return %c0_i32, %c0_i32_0, %c0_i32_1 : i32, i32, i32
  }
  func.func @transform_4(%arg0: i32) -> (i32, i32) {
    %c0_i32 = arith.constant 0 : i32
    %c0_i32_0 = arith.constant 0 : i32
    %c0_i32_1 = arith.constant 0 : i32
    return %c0_i32, %c0_i32_0 : i32, i32
  }
  func.func @transform_5(%arg0: i32) -> (i32, i32, i32) {
    %c0_i32 = arith.constant 0 : i32
    %c0_i32_0 = arith.constant 0 : i32
    %c0_i32_1 = arith.constant 0 : i32
    %c0_i32_2 = arith.constant 0 : i32
    return %c0_i32, %c0_i32_0, %c0_i32_1 : i32, i32, i32
  }
  func.func @transform_6(%arg0: i32) -> (i32, i32) {
    %c0_i32 = arith.constant 0 : i32
    %c0_i32_0 = arith.constant 0 : i32
    %c0_i32_1 = arith.constant 0 : i32
    return %c0_i32, %c0_i32_0 : i32, i32
  }
  func.func @transform_7(%arg0: i32) -> (i32, i32, i32) {
    %c0_i32 = arith.constant 0 : i32
    %c0_i32_0 = arith.constant 0 : i32
    %c0_i32_1 = arith.constant 0 : i32
    %c0_i32_2 = arith.constant 0 : i32
    return %c0_i32, %c0_i32_0, %c0_i32_1 : i32, i32, i32
  }
  func.func @transform_8(%arg0: i32) -> (i32, i32) {
    %c0_i32 = arith.constant 0 : i32
    %c0_i32_0 = arith.constant 0 : i32
    %c0_i32_1 = arith.constant 0 : i32
    return %c0_i32, %c0_i32_0 : i32, i32
  }
  func.func @transform_9(%arg0: i32) -> (i32, i32, i32) {
    %c0_i32 = arith.constant 0 : i32
    %c0_i32_0 = arith.constant 0 : i32
    %c0_i32_1 = arith.constant 0 : i32
    %c0_i32_2 = arith.constant 0 : i32
    return %c0_i32, %c0_i32_0, %c0_i32_1 : i32, i32, i32
  }
  func.func @transform_10(%arg0: i32) -> (i32, i32) {
    %c0_i32 = arith.constant 0 : i32
    %c0_i32_0 = arith.constant 0 : i32
    %c0_i32_1 = arith.constant 0 : i32
    return %c0_i32, %c0_i32_0 : i32, i32
  }
  func.func @transform_11(%arg0: i32) -> (i32, i32) {
    %c0_i32 = arith.constant 0 : i32
    %c0_i32_0 = arith.constant 0 : i32
    %c0_i32_1 = arith.constant 0 : i32
    return %c0_i32, %c0_i32_0 : i32, i32
  }
  func.func @transform_12(%arg0: i32) -> (i32, i32) {
    %c0_i32 = arith.constant 0 : i32
    %c0_i32_0 = arith.constant 0 : i32
    %c0_i32_1 = arith.constant 0 : i32
    return %c0_i32, %c0_i32_0 : i32, i32
  }
  func.func @transform_13(%arg0: i32) -> (i32, i32) {
    %c0_i32 = arith.constant 0 : i32
    %c0_i32_0 = arith.constant 0 : i32
    return %arg0, %c0_i32 : i32, i32
  }
}

</mosaic_0001>

<bundles_post_ra>
// kernel: tinyvgg_forward.1
= control target key start
LH: loop header
LB: loop body
LE: loop exit
PB: predicated region body
PF: predicated region fallthrough
CT: control target
= control target key end

     0   :  { %s4777_s25 = smov 0   ;;  %s5621_s0 = inlined_call_operand.vmem [shape: f32[320,48], index: 0, kind: input, shape index: {}]   ;;  %s5622_s1 = inlined_call_operand.vmem [shape: bf16[3,48,128], index: 1, kind: input, shape index: {}]   ;;  %s5623_s2 = inlined_call_operand.vmem [shape: f32[1,128], index: 2, kind: input, shape index: {}]   ;;  %s5624_s3 = inlined_call_operand.vmem [shape: bf16[3,128,128], index: 3, kind: input, shape index: {}]   ;;  %s5625_s4 = inlined_call_operand.vmem [shape: f32[1,128], index: 4, kind: input, shape index: {}]   ;;  %s5626_s5 = inlined_call_operand.vmem [shape: bf16[3,128,64], index: 5, kind: input, shape index: {}]   ;;  %s5627_s6 = inlined_call_operand.vmem [shape: f32[1,64], index: 6, kind: input, shape index: {}]   ;;  %s5628_s7 = inlined_call_operand.vmem [shape: bf16[3,64,64], index: 7, kind: input, shape index: {}]   ;;  %s5629_s8 = inlined_call_operand.vmem [shape: f32[1,64], index: 8, kind: input, shape index: {}]   ;;  %s5630_s9 = inlined_call_operand.vmem [shape: bf16[4,64,128], index: 9, kind: input, shape index: {}]   ;;  %s5631_s10 = inlined_call_operand.vmem [shape: f32[1,128], index: 10, kind: input, shape index: {}]   ;;  %s5632_s11 = inlined_call_operand.vmem [shape: f32[158,1], index: 11, kind: input, shape index: {}]   ;;  %s5633_s12 = inlined_call_operand.vmem [shape: f32[79,1], index: 12, kind: input, shape index: {}]   ;;  %s5634_s13 = inlined_call_operand.vmem [shape: f32[16,128], index: 13, kind: output, shape index: {}]  }
   0x1 LB: > { %s4783_s26 = sadd.s32 4294967295, %s4700_s25   ;;  %p3647_p0 = scmp.ge.s32.totalorder %s4700_s25, 1  ;;  %s4700_s25 = sphi %s4777_s25, %s23_s25  }
   0x2   : > { %p388_p1 = scmp.lt.s32.totalorder %s4700_s25, 3 }
   0x4   : > { %p389_p2 = pnand %p3647_p0, %p388_p1 }
   0x5   : > { %v4607_v0 = vld [vmem:[%s5622_s1 + $0x18] sm:$0xff] (!%p389_p2)   ;;  %s431_s29 = smul.u32 (!%p389_p2), 20, %s4783_s26  ;;  %v4608_v1 = vld [vmem:[%s5622_s1 + $0x20] sm:$0xff] (!%p389_p2)   ;;  %v4609_v2 = vld [vmem:[%s5622_s1 + $0x28] sm:$0xff] (!%p389_p2)   ;;  %v4702_v3 = vmov (!%p389_p2), 0   ;;  %vm539_vm0 = vcmask (!%p389_p2), 392192  }
   0x6   : > { %392 = sbr.rel (%p389_p2) target bundleno = 1735 (0x6c7), region = 72  ;;  %4086 = vmatprep.subr.bf16.mxu0 (!%p389_p2), %v4607_v0  ;;  %4605 = vset.pattern.permute.xlu0 (!%p389_p2), %v4702_v3  ;;  %v4610_v4 = vld [vmem:[%s5622_s1] sm:$0xff] (!%p389_p2)   ;;  %v4611_v14 = vld [vmem:[%s5622_s1 + $0x8] sm:$0xff] (!%p389_p2)   ;;  %v4612_v19 = vld [vmem:[%s5622_s1 + $0x10] sm:$0xff] (!%p389_p2)   ;;  %vm4704_vm1 = vmmov (!%p389_p2), 0   ;;  %s4705_s15 = smov (!%p389_p2), 120  }
   0x7   : > { %p432_p3 = scmp.lt.s32.totalorder (!%p389_p2), %s431_s29, 39  ;;  %4087 = vmatpush3.bf16.msra.mxu0 (!%p389_p2), %v4607_v0  ;;  %4606 = vset.pattern.permute.xlu1 (!%p389_p2), %v4702_v3  ;;  %v4827_v22 = vld [vmem:[%s5622_s1 + $0x30] sm:$0xff] (!%p389_p2)   ;;  %v1109_v29 = vld [vmem:[%s5632_s11] sm:$0xff] (!%p389_p2)  ;;  %v1110_v33 = vld [vmem:[%s5632_s11 + $0x8] sm:$0xff] (!%p389_p2)  ;;  %vm445_vm2 = vcmask (!%p389_p2), 516096   ;;  %vm2723_vm3 = vcmask (!%p389_p2), 523264  }
   0x8   : > { %4088 = vmatprep.subr.bf16.mxu0 (!%p389_p2), %v4608_v1  ;;  %v1111_v30 = vld [vmem:[%s5632_s11 + $0x10] sm:$0xff] (!%p389_p2)  ;;  %1131 = vperm.xlu0 (!%p389_p2), %4605, %v1109_v29   ;;  %v1112_v36 = vld [vmem:[%s5632_s11 + $0x18] sm:$0xff] (!%p389_p2)  ;;  %v1113_v39 = vld [vmem:[%s5632_s11 + $0x20] sm:$0xff] (!%p389_p2)  ;;  %vm2733_vm4 = vcmask (!%p389_p2), 521216   ;;  %s4706_s30 = smov (!%p389_p2), 56   ;;  %vm3248_vm5 = vcmask (!%p389_p2), 457728  }
   0x9   : > { %1141 = vperm.xlu1 (!%p389_p2), %4606, %v1111_v30   ;;  %v1114_v40 = vld [vmem:[%s5632_s11 + $0x28] sm:$0xff] (!%p389_p2)  ;;  %v1115_v43 = vld [vmem:[%s5632_s11 + $0x30] sm:$0xff] (!%p389_p2)  ;;  %v1116_v46 = vld [vmem:[%s5632_s11 + $0x38] sm:$0xff] (!%p389_p2)  ;;  %vm3263_vm6 = vcmask (!%p389_p2), 522240   ;;  %p437_p4 = scmp.lt.s32.totalorder (!%p389_p2), %s4783_s26, 1 }
   0xa   : > { %v1117_v47 = vld [vmem:[%s5632_s11 + $0x40] sm:$0xff] (!%p389_p2)  ;;  %v1118_v49 = vld [vmem:[%s5632_s11 + $0x48] sm:$0xff] (!%p389_p2)  ;;  %v1119_v53 = vld [vmem:[%s5632_s11 + $0x50] sm:$0xff] (!%p389_p2) }
   0xb   : > { %4089 = vmatpush3.bf16.msra.mxu0 (!%p389_p2), %v4608_v1  ;;  %v1120_v56 = vld [vmem:[%s5632_s11 + $0x58] sm:$0xff] (!%p389_p2)  ;;  %v1121_v57 = vld [vmem:[%s5632_s11 + $0x60] sm:$0xff] (!%p389_p2)  ;;  %v1122_v61 = vld [vmem:[%s5632_s11 + $0x68] sm:$0xff] (!%p389_p2) }
   0xc   : > { %4090 = vmatprep.subr.bf16.mxu0 (!%p389_p2), %v4609_v2  ;;  %1136 = vperm.xlu0 (!%p389_p2), %4605, %v1110_v33   ;;  %v4614_v59 = vld [vmem:[%s5622_s1 + $0x38] sm:$0xff] (!%p389_p2)   ;;  %v1123_v0 = vld [vmem:[%s5632_s11 + $0x70] sm:$0xff] (!%p389_p2)  ;;  %v4616_v1 = vld [vmem:[%s5624_s3 + $0x40] sm:$0xff] (!%p389_p2)  }
   0xd   : > { %s5636_s29 = smov (!%p432_p3, %s431_s29), 39  ;;  %1146 = vperm.xlu1 %4606, %v1112_v36   ;;  %4164 = vmatprep.subr.bf16.mxu1 %v4616_v1  ;;  %s5638_s26 = smov (!%p437_p4, %s4783_s26), 1 }
   0xe   : > { %s3648_s17 = sshll.u32 %s5636_s29, 3  ;;  %4165 = vmatpush3.bf16.msra.mxu1 %v4616_v1  ;;  %v4623_v1 = vld [vmem:[%s5624_s3 + $0x78] sm:$0xff]  }
   0xf   : > { %s4800_s20 = scalar_lea.vmem %s5621_s0, %s3648_s17  ;;  %4091 = vmatpush3.bf16.msra.mxu0 %v4609_v2 }
  0x10   : > { %v484_v5 = vld [vmem:[%s4800_s20 + $0x1] sm:$0xff]  ;;  %v485_v6 = vld [vmem:[%s4800_s20 + $0x9] sm:$0xff]  ;;  %v486_v7 = vld [vmem:[%s4800_s20 + $0x11] sm:$0xff]  ;;  %4112 = vmatprep.subr.bf16.mxu0 %v4610_v4  ;;  %1151 = vperm.xlu0 %4605, %v1113_v39  }
  0x11   : > { %v504_v8 = vpack.c.bf16 %v485_v6, %v484_v5  ;;  %v487_v9 = vld [vmem:[%s4800_s20 + $0x19] sm:$0xff]  ;;  %v488_v10 = vld [vmem:[%s4800_s20 + $0x21] sm:$0xff]  ;;  %v489_v11 = vld [vmem:[%s4800_s20 + $0x29] sm:$0xff]  ;;  %1156 = vperm.xlu1 %4606, %v1114_v40  }
  0x12   : > { %v505_v12 = vpack.c.bf16 %v487_v9, %v486_v7  ;;  %v506_v13 = vpack.c.bf16 %v489_v11, %v488_v10  ;;  %v490_v15 = vld [vmem:[%s4800_s20 + $0x31] sm:$0xff]  ;;  %v491_v16 = vld [vmem:[%s4800_s20 + $0x39] sm:$0xff]  ;;  %v492_v17 = vld [vmem:[%s4800_s20 + $0x41] sm:$0xff] }
  0x13   : > { %4092 = vmatprep.mubr.msk.bf16.mxu0 %vm539_vm0, %v504_v8  ;;  %v493_v18 = vld [vmem:[%s4800_s20 + $0x49] sm:$0xff]  ;;  %v507_v20 = vpack.c.bf16 %v491_v16, %v490_v15  ;;  %v494_v23 = vld [vmem:[%s4800_s20 + $0x51] sm:$0xff]  ;;  %v495_v24 = vld [vmem:[%s4800_s20 + $0x59] sm:$0xff] }
  0x14   : > { %4093 = vmatmul.mubr.msk.bf16.vlgmr.msra.gmra.mrb[0].mxu0 %vm539_vm0, %v505_v12  ;;  %v508_v21 = vpack.c.bf16 %v493_v18, %v492_v17  ;;  %v496_v25 = vld [vmem:[%s4800_s20 + $0x61] sm:$0xff]  ;;  %v497_v26 = vld [vmem:[%s4800_s20 + $0x69] sm:$0xff]  ;;  %v509_v27 = vpack.c.bf16 %v495_v24, %v494_v23  ;;  %v498_v31 = vld [vmem:[%s4800_s20 + $0x71] sm:$0xff]  ;;  %1161 = vperm.xlu0 %4605, %v1115_v43  }
  0x15   : > { %4113 = vmatpush3.bf16.msra.mxu0 %v4610_v4  ;;  %4096 = vmatprep.mubr.msk.bf16.mxu0 %vm539_vm0, %v506_v13  ;;  %v510_v28 = vpack.c.bf16 %v497_v26, %v496_v25  ;;  %v499_v32 = vld [vmem:[%s4800_s20 + $0x79] sm:$0xff]  ;;  %v500_v34 = vld [vmem:[%s4800_s20 + $0x81] sm:$0xff]  ;;  %v501_v35 = vld [vmem:[%s4800_s20 + $0x89] sm:$0xff] }
  0x16   : > { %4114 = vmatprep.subr.bf16.mxu0 %v4611_v14  ;;  %v511_v37 = vpack.c.bf16 %v499_v32, %v498_v31  ;;  %v512_v38 = vpack.c.bf16 %v501_v35, %v500_v34  ;;  %v502_v41 = vld [vmem:[%s4800_s20 + $0x91] sm:$0xff]  ;;  %v503_v42 = vld [vmem:[%s4800_s20 + $0x99] sm:$0x3f]  ;;  %v448_v44 = vld [vmem:[%s4800_s20] sm:$0xff]  ;;  %1166 = vperm.xlu1 %4606, %v1116_v46  }
  0x17   : > { %v449_v45 = vld [vmem:[%s4800_s20 + $0x8] sm:$0xff]  ;;  %v513_v48 = vpack.c.bf16 %v503_v42, %v502_v41  ;;  %v450_v51 = vld [vmem:[%s4800_s20 + $0x10] sm:$0xff]  ;;  %v451_v52 = vld [vmem:[%s4800_s20 + $0x18] sm:$0xff] }
  0x18   : > { %v468_v50 = vpack.c.bf16 %v449_v45, %v448_v44  ;;  %v452_v54 = vld [vmem:[%s4800_s20 + $0x20] sm:$0xff]  ;;  %v453_v55 = vld [vmem:[%s4800_s20 + $0x28] sm:$0xff]  ;;  %1171 = vperm.xlu0 %4605, %v1117_v47   ;;  %v469_v58 = vpack.c.bf16 %v451_v52, %v450_v51  ;;  %v454_v62 = vld [vmem:[%s4800_s20 + $0x30] sm:$0xff] }
  0x19   : > { %4115 = vmatpush3.bf16.msra.mxu0 %v4611_v14  ;;  %v470_v60 = vpack.c.bf16 %v453_v55, %v452_v54  ;;  %v455_v63 = vld [vmem:[%s4800_s20 + $0x38] sm:$0xff]  ;;  %v456_v2 = vld [vmem:[%s4800_s20 + $0x40] sm:$0xff]  ;;  %v457_v3 = vld [vmem:[%s4800_s20 + $0x48] sm:$0xff] }
  0x1a   : > { %4116 = vmatprep.subr.bf16.mxu0 %v4612_v19  ;;  %1176 = vperm.xlu1 %4606, %v1118_v49   ;;  %v4615_v4 = vld [vmem:[%s5622_s1 + $0x40] sm:$0xff]   ;;  %v1124_v5 = vld [vmem:[%s5632_s11 + $0x78] sm:$0xff]  ;;  %v4617_v7 = vld [vmem:[%s5624_s3 + $0x48] sm:$0xff]   ;;  %v471_v8 = vpack.c.bf16 %v455_v63, %v454_v62  ;;  %v472_v9 = vpack.c.bf16 %v457_v3, %v456_v2  ;;  %v4703_v2 = vmov 0.0  }
  0x1b   : > { %v1125_v6 = vld [vmem:[%s5632_s11 + $0x80] sm:$0xff]  ;;  %v1126_v10 = vld [vmem:[%s5632_s11 + $0x88] sm:$0xff]  ;;  %4166 = vmatprep.subr.bf16.mxu1 %v4617_v7  ;;  %v458_v11 = vld [vmem:[%s4800_s20 + $0x50] sm:$0xff]  ;;  %442 = vst [vmem:[#allocation2] sm:$0x1] %v4703_v2 }
  0x1c   : > { %4097 = vmatmul.mubr.msk.bf16.gmra.mrb[4].mxu0 %vm539_vm0, %v507_v20  ;;  %1181 = vperm.xlu0 %4605, %v1119_v53   ;;  %v459_v12 = vld [vmem:[%s4800_s20 + $0x58] sm:$0xff]  ;;  %v1127_v13 = vld [vmem:[%s5632_s11 + $0x90] sm:$0xff]  ;;  %v460_v15 = vld [vmem:[%s4800_s20 + $0x60] sm:$0xff]  ;;  %443 = vst [vmem:[#allocation2 + $0x9f] sm:$0x1] %v4703_v2 }
  0x1d   : > { %4100 = vmatprep.mubr.msk.bf16.mxu0 %vm539_vm0, %v508_v21  ;;  %4117 = vmatpush3.bf16.msra.mxu0 %v4612_v19  ;;  %v4618_v14 = vld [vmem:[%s5624_s3 + $0x50] sm:$0xff]   ;;  %v461_v16 = vld [vmem:[%s4800_s20 + $0x68] sm:$0xff]  ;;  %v1128_v17 = vld [vmem:[%s5632_s11 + $0x98] sm:$0x3f]  ;;  %v473_v19 = vpack.c.bf16 %v459_v12, %v458_v11  ;;  %444 = vst [vmem:[#allocation4] sm:$0x1] %v4703_v2 }
  0x1e   : > { %4138 = vmatprep.subr.bf16.mxu0 %v4827_v22  ;;  %1186 = vperm.xlu1 %4606, %v1120_v56   ;;  %v2078_v18 = vld [vmem:[%s5633_s12] sm:$0xff]  ;;  %v474_v20 = vpack.c.bf16 %v461_v16, %v460_v15  ;;  %v2079_v21 = vld [vmem:[%s5633_s12 + $0x8] sm:$0xff]  ;;  %v463_v23 = vld [vmem:[%s4800_s20 + $0x78] sm:$0xff]  ;;  %446 = vst.msk [vmem:[#allocation5] sm:$0x1] %vm445_vm2, %v4703_v2 }
  0x1f   : > { %4167 = vmatpush3.bf16.msra.mxu1 %v4617_v7  ;;  %v464_v24 = vld [vmem:[%s4800_s20 + $0x80] sm:$0xff]  ;;  %v465_v25 = vld [vmem:[%s4800_s20 + $0x88] sm:$0xff]  ;;  %v467_v29 = vld [vmem:[%s4800_s20 + $0x98] sm:$0x3f]  ;;  %447 = vst.msk [vmem:[#allocation5 + $0x4f] sm:$0x1] %vm445_vm2, %v4703_v2 }
  0x20   : > { %1191 = vperm.xlu0 %4605, %v1121_v57   ;;  %4168 = vmatprep.subr.bf16.mxu1 %v4618_v14  ;;  %v844_v30 = vld [vmem:[%s4800_s20 + $0x2] sm:$0xff]  ;;  %v845_v31 = vld [vmem:[%s4800_s20 + $0xa] sm:$0xff]  ;;  %v846_v34 = vld [vmem:[%s4800_s20 + $0x12] sm:$0xff] }
  0x21   : > { %v864_v33 = vpack.c.bf16 %v845_v31, %v844_v30  ;;  %v847_v35 = vld [vmem:[%s4800_s20 + $0x1a] sm:$0xff]  ;;  %v848_v36 = vld [vmem:[%s4800_s20 + $0x22] sm:$0xff]  ;;  %v850_v40 = vld [vmem:[%s4800_s20 + $0x32] sm:$0xff] }
  0x22   : > { %1196 = vperm.xlu1 %4606, %v1122_v61   ;;  %v851_v41 = vld [vmem:[%s4800_s20 + $0x3a] sm:$0xff]  ;;  %v852_v42 = vld [vmem:[%s4800_s20 + $0x42] sm:$0xff]  ;;  %v853_v43 = vld [vmem:[%s4800_s20 + $0x4a] sm:$0xff] }
  0x23   : > { %4169 = vmatpush3.bf16.msra.mxu1 %v4618_v14  ;;  %v867_v44 = vpack.c.bf16 %v851_v41, %v850_v40  ;;  %v868_v45 = vpack.c.bf16 %v853_v43, %v852_v42  ;;  %v854_v46 = vld [vmem:[%s4800_s20 + $0x52] sm:$0xff]  ;;  %v855_v47 = vld [vmem:[%s4800_s20 + $0x5a] sm:$0xff]  ;;  %v857_v49 = vld [vmem:[%s4800_s20 + $0x6a] sm:$0xff] }
  0x24   : > { %4101 = vmatmul.mubr.msk.bf16.gmra.mrb[8].mxu0 %vm539_vm0, %v509_v27  ;;  %1201 = vperm.xlu0 %4605, %v1123_v0   ;;  %v476_v27 = vpack.c.bf16 %v465_v25, %v464_v24  ;;  %v858_v52 = vld [vmem:[%s4800_s20 + $0x72] sm:$0xff]  ;;  %v859_v53 = vld [vmem:[%s4800_s20 + $0x7a] sm:$0xff]  ;;  %v860_v54 = vld [vmem:[%s4800_s20 + $0x82] sm:$0xff] }
  0x25   : > { %4104 = vmatprep.mubr.msk.bf16.mxu0 %vm539_vm0, %v510_v28  ;;  %v466_v28 = vld [vmem:[%s4800_s20 + $0x90] sm:$0xff]  ;;  %v871_v56 = vpack.c.bf16 %v859_v53, %v858_v52  ;;  %v4619_v61 = vld [vmem:[%s5624_s3 + $0x58] sm:$0xff]   ;;  %v4620_v62 = vld [vmem:[%s5624_s3 + $0x60] sm:$0xff]  }
  0x26   : > { %1206 = vperm.xlu1 %4606, %v1124_v5   ;;  %v477_v32 = vpack.c.bf16 %v467_v29, %v466_v28  ;;  %v861_v55 = vld [vmem:[%s4800_s20 + $0x8a] sm:$0xff]  ;;  %4170 = vmatprep.subr.bf16.mxu1 %v4619_v61  ;;  %v4624_v3 = vld [vmem:[%s5624_s3] sm:$0xff]  }
  0x27   : > { %v872_v57 = vpack.c.bf16 %v861_v55, %v860_v54  ;;  %4171 = vmatpush3.bf16.msra.mxu1 %v4619_v61  ;;  %v4621_v63 = vld [vmem:[%s5624_s3 + $0x68] sm:$0xff]   ;;  %v4622_v0 = vld [vmem:[%s5624_s3 + $0x70] sm:$0xff]  }
  0x28   : > { %1211 = vperm.xlu0 %4605, %v1125_v6   ;;  %4172 = vmatprep.subr.bf16.mxu1 %v4620_v62  ;;  %v4625_v41 = vld [vmem:[%s5624_s3 + $0x8] sm:$0xff]  }
  0x2a   : > { %1216 = vperm.xlu1 %4606, %v1126_v10   ;;  %v5014_v10 = vld [vmem:[%s5623_s2] ss:$0 sm:$0xff] }
  0x2b   : > { %4173 = vmatpush3.bf16.msra.mxu1 %v4620_v62 }
  0x2c   : > { %4105 = vmatmul.mubr.msk.bf16.gmra.mrb[12].mxu0 %vm539_vm0, %v511_v37  ;;  %1221 = vperm.xlu0 %4605, %v1127_v13   ;;  %v849_v37 = vld [vmem:[%s4800_s20 + $0x2a] sm:$0xff] }
  0x2d   : > { %4108 = vmatprep.mubr.msk.bf16.mxu0 %vm539_vm0, %v512_v38  ;;  %v865_v38 = vpack.c.bf16 %v847_v35, %v846_v34  ;;  %v866_v39 = vpack.c.bf16 %v849_v37, %v848_v36  ;;  %4174 = vmatprep.subr.bf16.mxu1 %v4621_v63 }
  0x2e   : > { %1226 = vperm.xlu1 %4606, %v1128_v17  }
  0x2f   : > { %4175 = vmatpush3.bf16.msra.mxu1 %v4621_v63 }
  0x30   : > { %2090 = vperm.xlu0 %4605, %v2078_v18   ;;  %4176 = vmatprep.subr.bf16.mxu1 %v4622_v0 }
  0x32   : > { %2095 = vperm.xlu1 %4606, %v2079_v21  }
  0x33   : > { %4177 = vmatpush3.bf16.msra.mxu1 %v4622_v0  ;;  %v4627_v0 = vld [vmem:[%s5624_s3 + $0x18] sm:$0xff]  }
  0x34   : > { %4109 = vmatmul.mubr.msk.bf16.gmra.mrb[16].mxu0 %vm539_vm0, %v513_v48  ;;  %v856_v48 = vld [vmem:[%s4800_s20 + $0x62] sm:$0xff]  ;;  %4178 = vmatprep.subr.bf16.mxu1 %v4623_v1 }
  0x35   : > { %4118 = vmatprep.mubr.msk.bf16.mxu0 %vm539_vm0, %v468_v50  ;;  %v869_v50 = vpack.c.bf16 %v855_v47, %v854_v46  ;;  %v870_v51 = vpack.c.bf16 %v857_v49, %v856_v48 }
  0x37   : > { %4179 = vmatpush3.bf16.msra.mxu1 %v4623_v1 }
  0x38   : > { %4200 = vmatprep.subr.bf16.mxu1 %v4624_v3 }
  0x3c   : > { %4119 = vmatmul.mubr.msk.bf16.vlgmr.msra.gmra.mrb[0].mxu0 %vm539_vm0, %v469_v58  ;;  %v862_v58 = vld [vmem:[%s4800_s20 + $0x92] sm:$0xff] }
  0x3d   : > { %4139 = vmatpush3.bf16.msra.mxu0 %v4827_v22  ;;  %4122 = vmatprep.mubr.msk.bf16.mxu0 %vm539_vm0, %v470_v60  ;;  %v462_v22 = vld [vmem:[%s4800_s20 + $0x70] sm:$0xff] }
  0x3e   : > { %4140 = vmatprep.subr.bf16.mxu0 %v4614_v59  ;;  %v475_v26 = vpack.c.bf16 %v463_v23, %v462_v22 }
  0x41   : > { %4141 = vmatpush3.bf16.msra.mxu0 %v4614_v59  ;;  %v863_v59 = vld [vmem:[%s4800_s20 + $0x9a] sm:$0x3f] }
  0x42   : > { %4142 = vmatprep.subr.bf16.mxu0 %v4615_v4  ;;  %v873_v60 = vpack.c.bf16 %v863_v59, %v862_v58 }
  0x44   : > { %4123 = vmatmul.mubr.msk.bf16.gmra.mrb[4].mxu0 %vm539_vm0, %v471_v8 }
  0x45   : > { %4126 = vmatprep.mubr.msk.bf16.mxu0 %vm539_vm0, %v472_v9  ;;  %4143 = vmatpush3.bf16.msra.mxu0 %v4615_v4 }
  0x46   : > { %4272 = vmatprep.subr.bf16.mxu0 %v4703_v2 }
  0x4c   : > { %4127 = vmatmul.mubr.msk.bf16.gmra.mrb[8].mxu0 %vm539_vm0, %v473_v19 }
  0x4d   : > { %4130 = vmatprep.mubr.msk.bf16.mxu0 %vm539_vm0, %v474_v20 }
  0x54   : > { %4131 = vmatmul.mubr.msk.bf16.gmra.mrb[12].mxu0 %vm539_vm0, %v475_v26 }
  0x55   : > { %4134 = vmatprep.mubr.msk.bf16.mxu0 %vm539_vm0, %v476_v27 }
  0x5c   : > { %4135 = vmatmul.mubr.msk.bf16.gmra.mrb[16].mxu0 %vm539_vm0, %v477_v32 }
  0x5d   : > { %4144 = vmatprep.mubr.msk.bf16.mxu0 %vm539_vm0, %v864_v33 }
  0x64   : > { %4145 = vmatmul.mubr.msk.bf16.vlgmr.msra.gmra.mrb[0].mxu0 %vm539_vm0, %v865_v38 }
  0x65   : > { %4148 = vmatprep.mubr.msk.bf16.mxu0 %vm539_vm0, %v866_v39 }
  0x6c   : > { %4149 = vmatmul.mubr.msk.bf16.gmra.mrb[4].mxu0 %vm539_vm0, %v867_v44 }
  0x6d   : > { %4152 = vmatprep.mubr.msk.bf16.mxu0 %vm539_vm0, %v868_v45 }
  0x74   : > { %4153 = vmatmul.mubr.msk.bf16.gmra.mrb[8].mxu0 %vm539_vm0, %v869_v50 }
  0x75   : > { %4156 = vmatprep.mubr.msk.bf16.mxu0 %vm539_vm0, %v870_v51  ;;  %v4626_v51 = vld [vmem:[%s5624_s3 + $0x10] sm:$0xff]  }
  0x7c   : > { %4157 = vmatmul.mubr.msk.bf16.gmra.mrb[12].mxu0 %vm539_vm0, %v871_v56 }
  0x7d   : > { %4160 = vmatprep.mubr.msk.bf16.mxu0 %vm539_vm0, %v872_v57 }
  0x84   : > { %4161 = vmatmul.mubr.msk.bf16.gmra.mrb[16].mxu0 %vm539_vm0, %v873_v60 }
  0x85   : > { %4288 = vmatprep.mubr.msk.bf16.mxu0 %vm4704_vm1, %v4703_v2 }
  0x87   : > { %v1132_v4 = vpop.permute.xlu0 %1131 }
  0x88   : > { %v1142_v5 = vpop.permute.xlu1 %1141 }
  0x8b   : > { %v1137_v6 = vpop.permute.xlu0 %1136 }
  0x8c   : > { %v1147_v7 = vpop.permute.xlu1 %1146 }
  0x8f   : > { %v1152_v8 = vpop.permute.xlu0 %1151 }
  0x90   : > { %v1157_v9 = vpop.permute.xlu1 %1156 }
  0x93   : > { %v1162_v11 = vpop.permute.xlu0 %1161 }
  0x95   : > { %v1167_v15 = vpop.permute.xlu1 %1166 }
  0x97   : > { %v1172_v25 = vpop.permute.xlu0 %1171 }
  0x99   : > { %v5020_v29 = vpop.permute.xlu1 %1176 }
  0x9b   : > { %v1182_v42 = vpop.permute.xlu0 %1181 }
  0x9d   : > { %v1187_v47 = vpop.permute.xlu1 %1186 }
  0x9f   : > { %v1192_v57 = vpop.permute.xlu0 %1191 }
  0xa1   : > { %v1197_v1 = vpop.permute.xlu1 %1196 }
 0x137   : > { %v4146_v12 = vpop.f32.mrb[0].mxu0 }
 0x138   : > { %v1071_v13 = vadd.f32 %v4146_v12, %v5014_v10  ;;  %v963_v14 = vpop.f32.mrb[1].mxu0  ;;  %v1202_v12 = vpop.permute.xlu0 %1201 }
 0x139   : > { %v1069_v16 = vadd.f32 %v5014_v10, %v963_v14  ;;  %v4147_v17 = vpop.f32.mrb[2].mxu0 }
 0x13a   : > { %v1091_v18 = vmax.f32 %v1071_v13, 0.0  ;;  %v1072_v19 = vadd.f32 %v4147_v17, %v5014_v10  ;;  %v966_v20 = vpop.f32.mrb[3].mxu0 }
 0x13b   : > { %v1089_v21 = vmax.f32 %v1069_v16, 0.0  ;;  %v1070_v22 = vadd.f32 %v5014_v10, %v966_v20 }
 0x13c   : > { %v1231_v23 = vmul.f32 %v1142_v5, %v1091_v18  ;;  %v1092_v24 = vmax.f32 %v1072_v19, 0.0  ;;  %v1207_v18 = vpop.permute.xlu1 %1206 }
 0x13d   : > { %v1229_v26 = vmul.f32 %v1132_v4, %v1089_v21  ;;  %v1090_v27 = vmax.f32 %v1070_v22, 0.0 }
 0x13e   : > { %1251 = vst [vmem:[#allocation2 + $0x11] sm:$0xff] %v1231_v23  ;;  %v1232_v28 = vmul.f32 %v1147_v7, %v1092_v24 }
 0x13f   : > { %1249 = vst [vmem:[#allocation2 + $0x1] sm:$0xff] %v1229_v26  ;;  %v1230_v30 = vmul.f32 %v1137_v6, %v1090_v27  ;;  %v4150_v31 = vpop.f32.mrb[4].mxu0 }
 0x140   : > { %1252 = vst [vmem:[#allocation2 + $0x19] sm:$0xff] %v1232_v28  ;;  %v1075_v32 = vadd.f32 %v4150_v31, %v5014_v10  ;;  %v979_v33 = vpop.f32.mrb[5].mxu0  ;;  %v1336_v34 = vpack.c.bf16 %v1232_v28, %v1231_v23 }
 0x141   : > { %1250 = vst [vmem:[#allocation2 + $0x9] sm:$0xff] %v1230_v30  ;;  %v1073_v35 = vadd.f32 %v5014_v10, %v979_v33  ;;  %v4151_v36 = vpop.f32.mrb[6].mxu0  ;;  %v1335_v37 = vpack.c.bf16 %v1230_v30, %v1229_v26  ;;  %v1212_v30 = vpop.permute.xlu0 %1211 }
 0x142   : > { %v1095_v38 = vmax.f32 %v1075_v32, 0.0  ;;  %v1076_v39 = vadd.f32 %v4151_v36, %v5014_v10  ;;  %v982_v40 = vpop.f32.mrb[7].mxu0 }
 0x143   : > { %v1093_v43 = vmax.f32 %v1073_v35, 0.0  ;;  %v1074_v44 = vadd.f32 %v5014_v10, %v982_v40  ;;  %4180 = vmatprep.mubr.bf16.mxu1 %v1335_v37  ;;  %v1217_v35 = vpop.permute.xlu1 %1216 }
 0x144   : > { %v1235_v45 = vmul.f32 %v1162_v11, %v1095_v38  ;;  %v1096_v46 = vmax.f32 %v1076_v39, 0.0  ;;  %4181 = vmatmul.mubr.bf16.vlgmr.msra.gmra.mrb[0].mxu1 %v1336_v34  ;;  %v4628_v11 = vld [vmem:[%s5624_s3 + $0x20] sm:$0xff]   ;;  %v4630_v34 = vld [vmem:[%s5624_s3 + $0x30] sm:$0xff]  }
 0x145   : > { %v1233_v48 = vmul.f32 %v1152_v8, %v1093_v43  ;;  %v1094_v49 = vmax.f32 %v1074_v44, 0.0  ;;  %4201 = vmatpush3.bf16.msra.mxu1 %v4624_v3 }
 0x146   : > { %1255 = vst [vmem:[#allocation2 + $0x31] sm:$0xff] %v1235_v45  ;;  %v1236_v50 = vmul.f32 %v1167_v15, %v1096_v46  ;;  %4202 = vmatprep.subr.bf16.mxu1 %v4625_v41 }
 0x147   : > { %1253 = vst [vmem:[#allocation2 + $0x21] sm:$0xff] %v1233_v48  ;;  %v1234_v52 = vmul.f32 %v1157_v9, %v1094_v49  ;;  %v4154_v53 = vpop.f32.mrb[8].mxu0 }
 0x148   : > { %1256 = vst [vmem:[#allocation2 + $0x39] sm:$0xff] %v1236_v50  ;;  %v1079_v54 = vadd.f32 %v4154_v53, %v5014_v10  ;;  %v995_v55 = vpop.f32.mrb[9].mxu0  ;;  %v1338_v56 = vpack.c.bf16 %v1236_v50, %v1235_v45  ;;  %v1227_v53 = vpop.permute.xlu1 %1226 }
 0x149   : > { %1254 = vst [vmem:[#allocation2 + $0x29] sm:$0xff] %v1234_v52  ;;  %v1077_v58 = vadd.f32 %v5014_v10, %v995_v55  ;;  %v4155_v59 = vpop.f32.mrb[10].mxu0  ;;  %4203 = vmatpush3.bf16.msra.mxu1 %v4625_v41  ;;  %v1337_v60 = vpack.c.bf16 %v1234_v52, %v1233_v48  ;;  %v1222_v48 = vpop.permute.xlu0 %1221 }
 0x14a   : > { %v1099_v61 = vmax.f32 %v1079_v54, 0.0  ;;  %v1080_v62 = vadd.f32 %v4155_v59, %v5014_v10  ;;  %v998_v63 = vpop.f32.mrb[11].mxu0  ;;  %4204 = vmatprep.subr.bf16.mxu1 %v4626_v51  ;;  %v1270_v59 = vld [vmem:[#allocation2 + $0x8] sm:$0xff] }
 0x14b   : > { %v1097_v3 = vmax.f32 %v1077_v58, 0.0  ;;  %v1078_v4 = vadd.f32 %v5014_v10, %v998_v63  ;;  %4184 = vmatprep.mubr.bf16.mxu1 %v1337_v60 }
 0x14c   : > { %v1239_v5 = vmul.f32 %v1182_v42, %v1099_v61  ;;  %v1100_v6 = vmax.f32 %v1080_v62, 0.0  ;;  %4185 = vmatmul.mubr.bf16.gmra.mrb[4].mxu1 %v1338_v56  ;;  %v1269_v62 = vld [vmem:[#allocation2] sm:$0xff] }
 0x14d   : > { %v1237_v7 = vmul.f32 %v1172_v25, %v1097_v3  ;;  %v1098_v8 = vmax.f32 %v1078_v4, 0.0  ;;  %4205 = vmatpush3.bf16.msra.mxu1 %v4626_v51  ;;  %v4629_v25 = vld [vmem:[%s5624_s3 + $0x28] sm:$0xff]   ;;  %v1289_v63 = vpack.c.bf16 %v1270_v59, %v1269_v62 }
 0x14e   : > { %1259 = vst [vmem:[#allocation2 + $0x51] sm:$0xff] %v1239_v5  ;;  %v1240_v9 = vmul.f32 %v1187_v47, %v1100_v6  ;;  %4206 = vmatprep.subr.bf16.mxu1 %v4627_v0  ;;  %v4631_v47 = vld [vmem:[%s5624_s3 + $0x38] sm:$0xff]   ;;  %v4633_v6 = vld [vmem:[%s5624_s3 + $0x88] sm:$0xff]  }
 0x14f   : > { %1257 = vst [vmem:[#allocation2 + $0x41] sm:$0xff] %v1237_v7  ;;  %v1238_v13 = vmul.f32 %v5020_v29, %v1098_v8  ;;  %v4158_v14 = vpop.f32.mrb[12].mxu0  ;;  %v4634_v8 = vld [vmem:[%s5624_s3 + $0x90] sm:$0xff]  }
 0x150   : > { %1260 = vst [vmem:[#allocation2 + $0x59] sm:$0xff] %v1240_v9  ;;  %v1083_v15 = vadd.f32 %v4158_v14, %v5014_v10  ;;  %v1011_v16 = vpop.f32.mrb[13].mxu0  ;;  %v1340_v17 = vpack.c.bf16 %v1240_v9, %v1239_v5  ;;  %v1274_v3 = vld [vmem:[#allocation2 + $0x28] sm:$0xff]  ;;  %v1273_v5 = vld [vmem:[#allocation2 + $0x20] sm:$0xff]  ;;  %v1275_v9 = vld [vmem:[#allocation2 + $0x30] sm:$0xff] }
 0x151   : > { %1258 = vst [vmem:[#allocation2 + $0x49] sm:$0xff] %v1238_v13  ;;  %v1081_v19 = vadd.f32 %v5014_v10, %v1011_v16  ;;  %v4159_v20 = vpop.f32.mrb[14].mxu0  ;;  %v1339_v21 = vpack.c.bf16 %v1238_v13, %v1237_v7  ;;  %4207 = vmatpush3.bf16.msra.mxu1 %v4627_v0  ;;  %v1271_v0 = vld [vmem:[#allocation2 + $0x10] sm:$0xff]  ;;  %v1291_v7 = vpack.c.bf16 %v1274_v3, %v1273_v5  ;;  %v4641_v3 = vld [vmem:[%s5626_s5] sm:$0xff]   ;;  %v4643_v5 = vld [vmem:[%s5626_s5 + $0x8] sm:$0xff]  }
 0x152   : > { %v1103_v22 = vmax.f32 %v1083_v15, 0.0  ;;  %v1084_v23 = vadd.f32 %v4159_v20, %v5014_v10  ;;  %v1014_v24 = vpop.f32.mrb[15].mxu0  ;;  %4208 = vmatprep.subr.bf16.mxu1 %v4628_v11  ;;  %v4635_v15 = vld [vmem:[%s5624_s3 + $0x98] sm:$0xff]  }
 0x153   : > { %v1101_v26 = vmax.f32 %v1081_v19, 0.0  ;;  %v1082_v27 = vadd.f32 %v5014_v10, %v1014_v24  ;;  %4188 = vmatprep.mubr.bf16.mxu1 %v1339_v21 }
 0x154   : > { %v1243_v28 = vmul.f32 %v1202_v12, %v1103_v22  ;;  %v1104_v29 = vmax.f32 %v1084_v23, 0.0  ;;  %4189 = vmatmul.mubr.bf16.gmra.mrb[8].mxu1 %v1340_v17  ;;  %v4636_v17 = vld [vmem:[%s5624_s3 + $0xa0] sm:$0xff]   ;;  %v4637_v23 = vld [vmem:[%s5624_s3 + $0xa8] sm:$0xff]  }
 0x155   : > { %v1241_v31 = vmul.f32 %v1192_v57, %v1101_v26  ;;  %v1102_v32 = vmax.f32 %v1082_v27, 0.0  ;;  %4209 = vmatpush3.bf16.msra.mxu1 %v4628_v11  ;;  %v4632_v57 = vld [vmem:[%s5624_s3 + $0x80] sm:$0xff]   ;;  %v1276_v11 = vld [vmem:[#allocation2 + $0x38] sm:$0xff] }
 0x156   : > { %1263 = vst [vmem:[#allocation2 + $0x71] sm:$0xff] %v1243_v28  ;;  %v1244_v33 = vmul.f32 %v1207_v18, %v1104_v29  ;;  %4210 = vmatprep.subr.bf16.mxu1 %v4629_v25  ;;  %v1292_v13 = vpack.c.bf16 %v1276_v11, %v1275_v9  ;;  %v1277_v14 = vld [vmem:[#allocation2 + $0x40] sm:$0xff]  ;;  %v4647_v9 = vld [vmem:[%s5626_s5 + $0x18] sm:$0xff]  }
 0x157   : > { %1261 = vst [vmem:[#allocation2 + $0x61] sm:$0xff] %v1241_v31  ;;  %v1242_v36 = vmul.f32 %v1197_v1, %v1102_v32  ;;  %v4162_v37 = vpop.f32.mrb[16].mxu0  ;;  %v1272_v1 = vld [vmem:[#allocation2 + $0x18] sm:$0xff]  ;;  %v4648_v11 = vld [vmem:[%s5626_s5 + $0x60] sm:$0xff]  }
 0x158   : > { %1264 = vst [vmem:[#allocation2 + $0x79] sm:$0xff] %v1244_v33  ;;  %v1087_v38 = vadd.f32 %v4162_v37, %v5014_v10  ;;  %v1027_v39 = vpop.f32.mrb[17].mxu0  ;;  %v1342_v40 = vpack.c.bf16 %v1244_v33, %v1243_v28  ;;  %v1290_v4 = vpack.c.bf16 %v1272_v1, %v1271_v0  ;;  %v1278_v12 = vld [vmem:[#allocation2 + $0x48] sm:$0xff]  ;;  %v1279_v18 = vld [vmem:[#allocation2 + $0x50] sm:$0xff]  ;;  %v1280_v19 = vld [vmem:[#allocation2 + $0x58] sm:$0xff] }
 0x159   : > { %1262 = vst [vmem:[#allocation2 + $0x69] sm:$0xff] %v1242_v36  ;;  %v1085_v41 = vadd.f32 %v5014_v10, %v1027_v39  ;;  %v4163_v42 = vpop.f32.mrb[18].mxu0  ;;  %v1341_v43 = vpack.c.bf16 %v1242_v36, %v1241_v31  ;;  %4211 = vmatpush3.bf16.msra.mxu1 %v4629_v25  ;;  %v1293_v16 = vpack.c.bf16 %v1278_v12, %v1277_v14  ;;  %v4638_v25 = vld [vmem:[%s5624_s3 + $0xb0] sm:$0xff]   ;;  %v4639_v31 = vld [vmem:[%s5624_s3 + $0xb8] sm:$0xff]   ;;  %v4640_v1 = vld [vmem:[%s5626_s5 + $0x40] sm:$0xff]  }
 0x15a   : > { %v1107_v44 = vmax.f32 %v1087_v38, 0.0  ;;  %v1088_v45 = vadd.f32 %v4163_v42, %v5014_v10  ;;  %v1030_v46 = vpop.f32.mrb[19].mxu0  ;;  %4212 = vmatprep.subr.bf16.mxu1 %v4630_v34  ;;  %v1294_v21 = vpack.c.bf16 %v1280_v19, %v1279_v18  ;;  %v1685_v36 = vld [vmem:[#allocation2 + $0xa] sm:$0xff]  ;;  %v1687_v39 = vld [vmem:[#allocation2 + $0x1a] sm:$0xff]  ;;  %v1686_v42 = vld [vmem:[#allocation2 + $0x12] sm:$0xff]  ;;  %4273 = vmatpush3.bf16.msra.mxu0 %v4640_v1 }
 0x15b   : > { %v1105_v49 = vmax.f32 %v1085_v41, 0.0  ;;  %v1086_v50 = vadd.f32 %v5014_v10, %v1030_v46  ;;  %4192 = vmatprep.mubr.bf16.mxu1 %v1341_v43  ;;  %v1689_v41 = vld [vmem:[#allocation2 + $0x2a] sm:$0xff]  ;;  %v1705_v43 = vpack.c.bf16 %v1687_v39, %v1686_v42  ;;  %v1692_v46 = vld [vmem:[#allocation2 + $0x42] sm:$0xff]  ;;  %4274 = vmatprep.subr.bf16.mxu0 %v4703_v2  ;;  %v5123_v12 = vld [vmem:[%s5625_s4] ss:$0 sm:$0xff] }
 0x15c   : > { %v1247_v51 = vmul.f32 %v1222_v48, %v1107_v44  ;;  %v1108_v52 = vmax.f32 %v1088_v45, 0.0  ;;  %4193 = vmatmul.mubr.bf16.gmra.mrb[12].mxu1 %v1342_v40  ;;  %v1688_v40 = vld [vmem:[#allocation2 + $0x22] sm:$0xff]  ;;  %v1691_v45 = vld [vmem:[#allocation2 + $0x3a] sm:$0xff]  ;;  %v1690_v48 = vld [vmem:[#allocation2 + $0x32] sm:$0xff] }
 0x15d   : > { %v1245_v54 = vmul.f32 %v1212_v30, %v1105_v49  ;;  %v1106_v55 = vmax.f32 %v1086_v50, 0.0  ;;  %4213 = vmatpush3.bf16.msra.mxu1 %v4630_v34  ;;  %v1706_v44 = vpack.c.bf16 %v1689_v41, %v1688_v40  ;;  %v1707_v49 = vpack.c.bf16 %v1691_v45, %v1690_v48  ;;  %v4650_v14 = vld [vmem:[%s5626_s5 + $0x68] sm:$0xff]   ;;  %v4655_v45 = vld [vmem:[%s5626_s5 + $0x38] sm:$0xff]  }
 0x15e   : > { %1267 = vst [vmem:[#allocation2 + $0x91] sm:$0xff] %v1247_v51  ;;  %v1248_v56 = vmul.f32 %v1227_v53, %v1108_v52  ;;  %4214 = vmatprep.subr.bf16.mxu1 %v4631_v47  ;;  %v1281_v22 = vld [vmem:[#allocation2 + $0x60] sm:$0xff] }
 0x15f   : > { %1265 = vst [vmem:[#allocation2 + $0x81] sm:$0xff] %v1245_v54  ;;  %v1246_v58 = vmul.f32 %v1217_v35, %v1106_v55  ;;  %v1284_v27 = vld [vmem:[#allocation2 + $0x78] sm:$0xff]  ;;  %v1684_v35 = vld [vmem:[#allocation2 + $0x2] sm:$0xff] }
 0x160   : > { %1268 = vst [vmem:[#allocation2 + $0x99] sm:$0x3f] %v1248_v56  ;;  %v1282_v20 = vld [vmem:[#allocation2 + $0x68] sm:$0xff]  ;;  %v1283_v26 = vld [vmem:[#allocation2 + $0x70] sm:$0xff]  ;;  %v1704_v38 = vpack.c.bf16 %v1685_v36, %v1684_v35 }
 0x161   : > { %1266 = vst [vmem:[#allocation2 + $0x89] sm:$0xff] %v1246_v58  ;;  %v1343_v10 = vpack.c.bf16 %v1246_v58, %v1245_v54  ;;  %4215 = vmatpush3.bf16.msra.mxu1 %v4631_v47  ;;  %v1295_v24 = vpack.c.bf16 %v1282_v20, %v1281_v22  ;;  %v1296_v29 = vpack.c.bf16 %v1284_v27, %v1283_v26  ;;  %v1693_v47 = vld [vmem:[#allocation2 + $0x4a] sm:$0xff]  ;;  %v1696_v52 = vld [vmem:[#allocation2 + $0x62] sm:$0xff]  ;;  %v1694_v54 = vld [vmem:[#allocation2 + $0x52] sm:$0xff] }
 0x162   : > { %4236 = vmatprep.subr.bf16.mxu1 %v4632_v57  ;;  %v1708_v50 = vpack.c.bf16 %v1693_v47, %v1692_v46  ;;  %v1697_v53 = vld [vmem:[#allocation2 + $0x6a] sm:$0xff]  ;;  %v1698_v59 = vld [vmem:[#allocation2 + $0x72] sm:$0xff] }
 0x163   : > { %4196 = vmatprep.mubr.bf16.mxu1 %v1343_v10  ;;  %v1710_v56 = vpack.c.bf16 %v1697_v53, %v1696_v52  ;;  %v4653_v35 = vld [vmem:[%s5626_s5 + $0x30] sm:$0xff]  }
 0x166   : > { %v1285_v30 = vld [vmem:[#allocation2 + $0x80] sm:$0xff] }
 0x167   : > { %v1334_v60 = vld [vmem:[#allocation2 + $0x99] sm:$0x3f] }
 0x168   : > { %v1344_v61 = vpack.c.bf16 %v1334_v60, %v1247_v51  ;;  %v1286_v28 = vld [vmem:[#allocation2 + $0x88] sm:$0xff]  ;;  %v1287_v33 = vld [vmem:[#allocation2 + $0x90] sm:$0xff]  ;;  %v1288_v34 = vld [vmem:[#allocation2 + $0x98] sm:$0x3f] }
 0x169   : > { %v1297_v32 = vpack.c.bf16 %v1286_v28, %v1285_v30  ;;  %v1298_v37 = vpack.c.bf16 %v1288_v34, %v1287_v33  ;;  %v1695_v51 = vld [vmem:[#allocation2 + $0x5a] sm:$0xff]  ;;  %v1700_v58 = vld [vmem:[#allocation2 + $0x82] sm:$0xff]  ;;  %v1701_v10 = vld [vmem:[#allocation2 + $0x8a] sm:$0xff] }
 0x16a   : > { %4197 = vmatmul.mubr.bf16.gmra.mrb[16].mxu1 %v1344_v61  ;;  %v1709_v55 = vpack.c.bf16 %v1695_v51, %v1694_v54  ;;  %v1712_v61 = vpack.c.bf16 %v1701_v10, %v1700_v58  ;;  %v1702_v62 = vld [vmem:[#allocation2 + $0x92] sm:$0xff] }
 0x16b   : > { %4216 = vmatprep.mubr.bf16.mxu1 %v1289_v63  ;;  %v1703_v63 = vld [vmem:[#allocation2 + $0x9a] sm:$0x3f]  ;;  %v5184_v10 = vld [vmem:[%s5633_s12 + $0x10] sm:$0xff] }
 0x16c   : > { %v1713_v0 = vpack.c.bf16 %v1703_v63, %v1702_v62  ;;  %v4654_v30 = vld [vmem:[%s5626_s5 + $0x78] sm:$0xff]  }
 0x172   : > { %4217 = vmatmul.mubr.bf16.vlgmr.msra.gmra.mrb[0].mxu1 %v1290_v4  ;;  %v4642_v4 = vld [vmem:[%s5626_s5 + $0x48] sm:$0xff]  }
 0x173   : > { %4220 = vmatprep.mubr.bf16.mxu1 %v1291_v7  ;;  %4237 = vmatpush3.bf16.msra.mxu1 %v4632_v57  ;;  %v1699_v57 = vld [vmem:[#allocation2 + $0x7a] sm:$0xff]  ;;  %v4645_v7 = vld [vmem:[%s5626_s5 + $0x10] sm:$0xff]  }
 0x174   : > { %4238 = vmatprep.subr.bf16.mxu1 %v4633_v6  ;;  %v1711_v60 = vpack.c.bf16 %v1699_v57, %v1698_v59  ;;  %4275 = vmatpush3.bf16.msra.mxu0 %v4642_v4 }
 0x175   : > { %4276 = vmatprep.subr.bf16.mxu0 %v4703_v2 }
 0x177   : > { %4239 = vmatpush3.bf16.msra.mxu1 %v4633_v6  ;;  %v4644_v6 = vld [vmem:[%s5626_s5 + $0x50] sm:$0xff]  }
 0x178   : > { %4240 = vmatprep.subr.bf16.mxu1 %v4634_v8  ;;  %4277 = vmatpush3.bf16.msra.mxu0 %v4644_v6 }
 0x179   : > { %4278 = vmatprep.subr.bf16.mxu0 %v4703_v2 }
 0x17a   : > { %4221 = vmatmul.mubr.bf16.gmra.mrb[4].mxu1 %v1292_v13 }
 0x17b   : > { %4224 = vmatprep.mubr.bf16.mxu1 %v1293_v16  ;;  %4241 = vmatpush3.bf16.msra.mxu1 %v4634_v8  ;;  %v4646_v8 = vld [vmem:[%s5626_s5 + $0x58] sm:$0xff]  }
 0x17c   : > { %4242 = vmatprep.subr.bf16.mxu1 %v4635_v15  ;;  %4279 = vmatpush3.bf16.msra.mxu0 %v4646_v8 }
 0x17d   : > { %4280 = vmatprep.subr.bf16.mxu0 %v4703_v2 }
 0x17f   : > { %4243 = vmatpush3.bf16.msra.mxu1 %v4635_v15 }
 0x180   : > { %4244 = vmatprep.subr.bf16.mxu1 %v4636_v17  ;;  %4281 = vmatpush3.bf16.msra.mxu0 %v4648_v11 }
 0x181   : > { %4282 = vmatprep.subr.bf16.mxu0 %v4703_v2 }
 0x182   : > { %4225 = vmatmul.mubr.bf16.gmra.mrb[8].mxu1 %v1294_v21 }
 0x183   : > { %4228 = vmatprep.mubr.bf16.mxu1 %v1295_v24  ;;  %4245 = vmatpush3.bf16.msra.mxu1 %v4636_v17  ;;  %v4649_v24 = vld [vmem:[%s5626_s5 + $0x20] sm:$0xff]  }
 0x184   : > { %4246 = vmatprep.subr.bf16.mxu1 %v4637_v23  ;;  %4283 = vmatpush3.bf16.msra.mxu0 %v4650_v14 }
 0x185   : > { %4284 = vmatprep.subr.bf16.mxu0 %v4703_v2 }
 0x187   : > { %4247 = vmatpush3.bf16.msra.mxu1 %v4637_v23 }
 0x188   : > { %4248 = vmatprep.subr.bf16.mxu1 %v4638_v25 }
 0x18a   : > { %4229 = vmatmul.mubr.bf16.gmra.mrb[12].mxu1 %v1296_v29  ;;  %v4651_v29 = vld [vmem:[%s5626_s5 + $0x28] sm:$0xff]  }
 0x18b   : > { %4232 = vmatprep.mubr.bf16.mxu1 %v1297_v32  ;;  %4249 = vmatpush3.bf16.msra.mxu1 %v4638_v25  ;;  %v4652_v25 = vld [vmem:[%s5626_s5 + $0x70] sm:$0xff]  }
 0x18c   : > { %4250 = vmatprep.subr.bf16.mxu1 %v4639_v31  ;;  %4285 = vmatpush3.bf16.msra.mxu0 %v4652_v25 }
 0x18d   : > { %4286 = vmatprep.subr.bf16.mxu0 %v4703_v2 }
 0x18f   : > { %4251 = vmatpush3.bf16.msra.mxu1 %v4639_v31 }
 0x190   : > { %4308 = vmatprep.subr.bf16.mxu1 %v4703_v2  ;;  %4287 = vmatpush3.bf16.msra.mxu0 %v4654_v30 }
 0x191   : > { %4344 = vmatprep.subr.bf16.mxu0 %v4703_v2 }
 0x192   : > { %4233 = vmatmul.mubr.bf16.gmra.mrb[16].mxu1 %v1298_v37 }
 0x193   : > { %4252 = vmatprep.mubr.bf16.mxu1 %v1704_v38 }
 0x19a   : > { %4253 = vmatmul.mubr.bf16.vlgmr.msra.gmra.mrb[0].mxu1 %v1705_v43 }
 0x19b   : > { %4256 = vmatprep.mubr.bf16.mxu1 %v1706_v44  ;;  %4309 = vmatpush3.bf16.msra.mxu1 %v4641_v3 }
 0x19c   : > { %4310 = vmatprep.subr.bf16.mxu1 %v4703_v2 }
 0x19f   : > { %4311 = vmatpush3.bf16.msra.mxu1 %v4643_v5 }
 0x1a0   : > { %4312 = vmatprep.subr.bf16.mxu1 %v4703_v2 }
 0x1a2   : > { %4257 = vmatmul.mubr.bf16.gmra.mrb[4].mxu1 %v1707_v49 }
 0x1a3   : > { %4260 = vmatprep.mubr.bf16.mxu1 %v1708_v50  ;;  %4313 = vmatpush3.bf16.msra.mxu1 %v4645_v7 }
 0x1a4   : > { %4314 = vmatprep.subr.bf16.mxu1 %v4703_v2 }
 0x1a7   : > { %4315 = vmatpush3.bf16.msra.mxu1 %v4647_v9 }
 0x1a8   : > { %4316 = vmatprep.subr.bf16.mxu1 %v4703_v2 }
 0x1aa   : > { %4261 = vmatmul.mubr.bf16.gmra.mrb[8].mxu1 %v1709_v55  ;;  %v5178_v55 = vld [vmem:[%s5633_s12 + $0x18] sm:$0xff] }
 0x1ab   : > { %4264 = vmatprep.mubr.bf16.mxu1 %v1710_v56  ;;  %4317 = vmatpush3.bf16.msra.mxu1 %v4649_v24 }
 0x1ac   : > { %4318 = vmatprep.subr.bf16.mxu1 %v4703_v2 }
 0x1af   : > { %4319 = vmatpush3.bf16.msra.mxu1 %v4651_v29 }
 0x1b0   : > { %4320 = vmatprep.subr.bf16.mxu1 %v4703_v2 }
 0x1b2   : > { %4265 = vmatmul.mubr.bf16.gmra.mrb[12].mxu1 %v1711_v60 }
 0x1b3   : > { %4268 = vmatprep.mubr.bf16.mxu1 %v1712_v61  ;;  %4321 = vmatpush3.bf16.msra.mxu1 %v4653_v35 }
 0x1b4   : > { %4322 = vmatprep.subr.bf16.mxu1 %v4703_v2 }
 0x1b7   : > { %4323 = vmatpush3.bf16.msra.mxu1 %v4655_v45 }
 0x1b8   : > { %4380 = vmatprep.subr.bf16.mxu1 %v4703_v2 }
 0x1ba   : > { %4269 = vmatmul.mubr.bf16.gmra.mrb[16].mxu1 %v1713_v0 }
 0x1bb   : > { %4324 = vmatprep.mubr.msk.bf16.mxu1 %vm4704_vm1, %v4703_v2 }
 0x26d   : > { %v4254_v13 = vpop.f32.mrb[0].mxu1 }
 0x26e   : > { %v1921_v15 = vadd.f32 %v4254_v13, %v5123_v12  ;;  %v1813_v16 = vpop.f32.mrb[1].mxu1  ;;  %v5203_v13 = vld [vmem:[%s5633_s12 + $0x28] sm:$0xff] }
 0x26f   : > { %v1919_v17 = vadd.f32 %v5123_v12, %v1813_v16  ;;  %v4255_v18 = vpop.f32.mrb[2].mxu1 }
 0x270   : > { %v1941_v19 = vmax.f32 %v1921_v15, 0.0  ;;  %v1922_v20 = vadd.f32 %v4255_v18, %v5123_v12  ;;  %v1816_v21 = vpop.f32.mrb[3].mxu1 }
 0x271   : > { %v1939_v22 = vmax.f32 %v1919_v17, 0.0  ;;  %v1920_v23 = vadd.f32 %v5123_v12, %v1816_v21  ;;  %v5209_v17 = vld [vmem:[%s5633_s12 + $0x20] sm:$0xff] }
 0x272   : > { %1961 = vst [vmem:[#allocation3 + $0x10] sm:$0xff] %v1941_v19  ;;  %v1942_v26 = vmax.f32 %v1922_v20, 0.0 }
 0x273   : > { %1959 = vst [vmem:[#allocation3] sm:$0xff] %v1939_v22  ;;  %v1940_v27 = vmax.f32 %v1920_v23, 0.0 }
 0x274   : > { %1962 = vst [vmem:[#allocation3 + $0x18] sm:$0xff] %v1942_v26 }
 0x275   : > { %1960 = vst [vmem:[#allocation3 + $0x8] sm:$0xff] %v1940_v27  ;;  %v4258_v28 = vpop.f32.mrb[4].mxu1 }
 0x276   : > { %v1925_v31 = vadd.f32 %v4258_v28, %v5123_v12  ;;  %v1829_v32 = vpop.f32.mrb[5].mxu1 }
 0x277   : > { %v1923_v33 = vadd.f32 %v5123_v12, %v1829_v32  ;;  %v4259_v34 = vpop.f32.mrb[6].mxu1 }
 0x278   : > { %v1945_v36 = vmax.f32 %v1925_v31, 0.0  ;;  %v1926_v37 = vadd.f32 %v4259_v34, %v5123_v12  ;;  %v1832_v38 = vpop.f32.mrb[7].mxu1 }
 0x279   : > { %v1943_v39 = vmax.f32 %v1923_v33, 0.0  ;;  %v1924_v40 = vadd.f32 %v5123_v12, %v1832_v38  ;;  %v2085_v33 = vld [vmem:[%s5633_s12 + $0x38] sm:$0xff] }
 0x27a   : > { %1965 = vst [vmem:[#allocation3 + $0x30] sm:$0xff] %v1945_v36  ;;  %v1946_v41 = vmax.f32 %v1926_v37, 0.0  ;;  %v2084_v37 = vld [vmem:[%s5633_s12 + $0x30] sm:$0xff] }
 0x27b   : > { %1963 = vst [vmem:[#allocation3 + $0x20] sm:$0xff] %v1943_v39  ;;  %v1944_v42 = vmax.f32 %v1924_v40, 0.0  ;;  %v1981_v43 = vld [vmem:[#allocation3 + $0x10] ss:$2 sm:$0xff]  ;;  %v2001_v44 = vld [vmem:[#allocation3 + $0x11] ss:$2 sm:$0xff] }
 0x27c   : > { %1966 = vst [vmem:[#allocation3 + $0x38] sm:$0xff] %v1946_v41  ;;  %v5164_v46 = vmax.f32 %v1981_v43, %v2001_v44  ;;  %v1979_v47 = vld [vmem:[#allocation3] ss:$2 sm:$0xff]  ;;  %v1999_v48 = vld [vmem:[#allocation3 + $0x1] ss:$2 sm:$0xff] }
 0x27d   : > { %1964 = vst [vmem:[#allocation3 + $0x28] sm:$0xff] %v1944_v42  ;;  %v4262_v49 = vpop.f32.mrb[8].mxu1  ;;  %v5167_v50 = vmax.f32 %v1979_v47, %v1999_v48 }
 0x27e   : > { %v1929_v51 = vadd.f32 %v4262_v49, %v5123_v12  ;;  %2040 = vrot.lane.b32.xlu1 %v5164_v46, %s4705_s15  ;;  %v1845_v52 = vpop.f32.mrb[9].mxu1  ;;  %v2086_v49 = vld [vmem:[%s5633_s12 + $0x40] sm:$0xff] }
 0x27f   : > { %v1927_v53 = vadd.f32 %v5123_v12, %v1845_v52  ;;  %2038 = vrot.lane.b32.xlu0 %v5167_v50, %s4705_s15  ;;  %v4263_v54 = vpop.f32.mrb[10].mxu1 }
 0x280   : > { %v1949_v56 = vmax.f32 %v1929_v51, 0.0  ;;  %v1930_v57 = vadd.f32 %v4263_v54, %v5123_v12  ;;  %v1848_v58 = vpop.f32.mrb[11].mxu1 }
 0x281   : > { %v1947_v59 = vmax.f32 %v1927_v53, 0.0  ;;  %v1928_v60 = vadd.f32 %v5123_v12, %v1848_v58  ;;  %v4692_v58 = vld [vmem:[%s5633_s12 + $0x8] sm:$0xff] }
 0x282   : > { %1969 = vst [vmem:[#allocation3 + $0x50] sm:$0xff] %v1949_v56  ;;  %v1950_v61 = vmax.f32 %v1930_v57, 0.0  ;;  %2105 = vperm.xlu1 %4606, %v5178_v55  }
 0x283   : > { %1967 = vst [vmem:[#allocation3 + $0x40] sm:$0xff] %v1947_v59  ;;  %v1948_v62 = vmax.f32 %v1928_v60, 0.0  ;;  %2100 = vperm.xlu0 %4605, %v5184_v10   ;;  %v1985_v63 = vld [vmem:[#allocation3 + $0x30] ss:$2 sm:$0xff]  ;;  %v2005_v0 = vld [vmem:[#allocation3 + $0x31] ss:$2 sm:$0xff] }
 0x284   : > { %1970 = vst [vmem:[#allocation3 + $0x58] sm:$0xff] %v1950_v61  ;;  %v5190_v1 = vmax.f32 %v1985_v63, %v2005_v0  ;;  %v1983_v3 = vld [vmem:[#allocation3 + $0x20] ss:$2 sm:$0xff]  ;;  %v2003_v4 = vld [vmem:[#allocation3 + $0x21] ss:$2 sm:$0xff]  ;;  %v2096_v61 = vpop.permute.xlu1 %2095 }
 0x285   : > { %1968 = vst [vmem:[#allocation3 + $0x48] sm:$0xff] %v1948_v62  ;;  %v4266_v5 = vpop.f32.mrb[12].mxu1  ;;  %v5192_v6 = vmax.f32 %v1983_v3, %v2003_v4  ;;  %v4693_v59 = vld [vmem:[%s5633_s12] sm:$0xff]  ;;  %v2662_v60 = vld [vmem:[%s5633_s12 + $0x48] sm:$0x3f]  ;;  %v2091_v62 = vpop.permute.xlu0 %2090 }
 0x286   : > { %v1933_v7 = vadd.f32 %v4266_v5, %v5123_v12  ;;  %2044 = vrot.lane.b32.xlu1 %v5190_v1, %s4705_s15  ;;  %v1861_v8 = vpop.f32.mrb[13].mxu1  ;;  %v4656_v5 = vld [vmem:[%s5626_s5 + $0x80] sm:$0xff]  }
 0x287   : > { %v1931_v9 = vadd.f32 %v5123_v12, %v1861_v8  ;;  %2042 = vrot.lane.b32.xlu0 %v5192_v6, %s4705_s15  ;;  %v4267_v11 = vpop.f32.mrb[14].mxu1  ;;  %v4657_v8 = vld [vmem:[%s5626_s5 + $0x88] sm:$0xff]  }
 0x288   : > { %v1953_v14 = vmax.f32 %v1933_v7, 0.0  ;;  %v1934_v15 = vadd.f32 %v4267_v11, %v5123_v12  ;;  %v1864_v16 = vpop.f32.mrb[15].mxu1 }
 0x289   : > { %v1951_v18 = vmax.f32 %v1931_v9, 0.0  ;;  %v1932_v19 = vadd.f32 %v5123_v12, %v1864_v16  ;;  %v4658_v9 = vld [vmem:[%s5626_s5 + $0x90] sm:$0xff]  }
 0x28a   : > { %1973 = vst [vmem:[#allocation3 + $0x70] sm:$0xff] %v1953_v14  ;;  %v1954_v20 = vmax.f32 %v1934_v15, 0.0  ;;  %2115 = vperm.xlu1 %4606, %v5203_v13   ;;  %v4659_v14 = vld [vmem:[%s5626_s5 + $0x98] sm:$0xff]  }
 0x28b   : > { %1971 = vst [vmem:[#allocation3 + $0x60] sm:$0xff] %v1951_v18  ;;  %v1952_v21 = vmax.f32 %v1932_v19, 0.0  ;;  %2110 = vperm.xlu0 %4605, %v5209_v17   ;;  %v1989_v22 = vld [vmem:[#allocation3 + $0x50] ss:$2 sm:$0xff]  ;;  %v2009_v23 = vld [vmem:[#allocation3 + $0x51] ss:$2 sm:$0xff] }
 0x28c   : > { %1974 = vst [vmem:[#allocation3 + $0x78] sm:$0xff] %v1954_v20  ;;  %v5214_v24 = vmax.f32 %v1989_v22, %v2009_v23  ;;  %v1987_v25 = vld [vmem:[#allocation3 + $0x40] ss:$2 sm:$0xff]  ;;  %v2007_v26 = vld [vmem:[#allocation3 + $0x41] ss:$2 sm:$0xff] }
 0x28d   : > { %1972 = vst [vmem:[#allocation3 + $0x68] sm:$0xff] %v1952_v21  ;;  %v4270_v27 = vpop.f32.mrb[16].mxu1  ;;  %v5216_v28 = vmax.f32 %v1987_v25, %v2007_v26  ;;  %v4661_v26 = vld [vmem:[%s5626_s5 + $0xa8] sm:$0xff]  }
 0x28e   : > { %v1937_v29 = vadd.f32 %v4270_v27, %v5123_v12  ;;  %2048 = vrot.lane.b32.xlu1 %v5214_v24, %s4705_s15  ;;  %v1877_v30 = vpop.f32.mrb[17].mxu1 }
 0x28f   : > { %v1935_v31 = vadd.f32 %v5123_v12, %v1877_v30  ;;  %2046 = vrot.lane.b32.xlu0 %v5216_v28, %s4705_s15  ;;  %v4271_v32 = vpop.f32.mrb[18].mxu1 }
 0x290   : > { %v1957_v34 = vmax.f32 %v1937_v29, 0.0  ;;  %v1938_v35 = vadd.f32 %v4271_v32, %v5123_v12  ;;  %v1880_v36 = vpop.f32.mrb[19].mxu1 }
 0x291   : > { %v1955_v38 = vmax.f32 %v1935_v31, 0.0  ;;  %v1936_v39 = vadd.f32 %v5123_v12, %v1880_v36  ;;  %v2087_v12 = vld [vmem:[%s5633_s12 + $0x48] sm:$0x7f] }
 0x292   : > { %1977 = vst [vmem:[#allocation3 + $0x90] sm:$0xff] %v1957_v34  ;;  %v1958_v40 = vmax.f32 %v1938_v35, 0.0  ;;  %2125 = vperm.xlu1 %4606, %v2085_v33  }
 0x293   : > { %1975 = vst [vmem:[#allocation3 + $0x80] sm:$0xff] %v1955_v38  ;;  %v1956_v41 = vmax.f32 %v1936_v39, 0.0  ;;  %2120 = vperm.xlu0 %4605, %v2084_v37   ;;  %v1993_v42 = vld [vmem:[#allocation3 + $0x70] ss:$2 sm:$0xff]  ;;  %v2013_v43 = vld [vmem:[#allocation3 + $0x71] ss:$2 sm:$0xff] }
 0x294   : > { %1978 = vst [vmem:[#allocation3 + $0x98] sm:$0x3f] %v1958_v40  ;;  %v5232_v44 = vmax.f32 %v1993_v42, %v2013_v43  ;;  %v1991_v45 = vld [vmem:[#allocation3 + $0x60] ss:$2 sm:$0xff]  ;;  %v2011_v47 = vld [vmem:[#allocation3 + $0x61] ss:$2 sm:$0xff] }
 0x295   : > { %1976 = vst [vmem:[#allocation3 + $0x88] sm:$0xff] %v1956_v41  ;;  %v5234_v48 = vmax.f32 %v1991_v45, %v2011_v47  ;;  %v4663_v39 = vld [vmem:[%s5626_s5 + $0xb8] sm:$0xff]  }
 0x296   : > { %2052 = vrot.lane.b32.xlu1 %v5232_v44, %s4705_s15 }
 0x297   : > { %2050 = vrot.lane.b32.xlu0 %v5234_v48, %s4705_s15 }
 0x29a   : > { %2135 = vperm.xlu1 %4606, %v2087_v12  }
 0x29b   : > { %2130 = vperm.xlu0 %4605, %v2086_v49   ;;  %v1997_v51 = vld [vmem:[#allocation3 + $0x90] ss:$2 sm:$0x7f]  ;;  %v2017_v52 = vld [vmem:[#allocation3 + $0x91] ss:$2 sm:$0x7f] }
 0x29c   : > { %v5246_v53 = vmax.f32 %v1997_v51, %v2017_v52  ;;  %v1995_v54 = vld [vmem:[#allocation3 + $0x80] ss:$2 sm:$0xff]  ;;  %v2015_v56 = vld [vmem:[#allocation3 + $0x81] ss:$2 sm:$0xff] }
 0x29d   : > { %v5248_v57 = vmax.f32 %v1995_v54, %v2015_v56 }
 0x29e   : > { %2056 = vrot.lane.b32.xlu1 %v5246_v53, %s4705_s15 }
 0x29f   : > { %2054 = vrot.lane.b32.xlu0 %v5248_v57, %s4705_s15 }
 0x2a2   : > { %2670 = vperm.xlu1 %4606, %v4692_v58  }
 0x2a3   : > { %2665 = vperm.xlu0 %4605, %v4693_v59  }
 0x2a6   : > { %2680 = vperm.xlu1 %4606, %v5178_v55  }
 0x2a7   : > { %2675 = vperm.xlu0 %4605, %v5184_v10  }
 0x2aa   : > { %2690 = vperm.xlu1 %4606, %v5203_v13  }
 0x2ab   : > { %2685 = vperm.xlu0 %4605, %v5209_v17   ;;  %v4660_v17 = vld [vmem:[%s5626_s5 + $0xa0] sm:$0xff]  }
 0x2ae   : > { %2700 = vperm.xlu1 %4606, %v2085_v33  }
 0x2af   : > { %2695 = vperm.xlu0 %4605, %v2084_v37  }
 0x2b2   : > { %2710 = vperm.xlu1 %4606, %v2662_v60  }
 0x2b3   : > { %2705 = vperm.xlu0 %4605, %v2086_v49  }
 0x2f0   : > { %v2041_v63 = vpop.permute.xlu1 %2040 }
 0x2f1   : > { %v2069_v0 = vmax.f32 %v5164_v46, %v2041_v63  ;;  %v2039_v55 = vpop.permute.xlu0 %2038 }
 0x2f2   : > { %v2068_v10 = vmax.f32 %v5167_v50, %v2039_v55 }
 0x2f3   : > { %v2139_v3 = vmul.f32 %v2096_v61, %v2069_v0 }
 0x2f4   : > { %v2138_v4 = vmul.f32 %v2091_v62, %v2068_v10 }
 0x2f5   : > { %2149 = vst [vmem:[#allocation4 + $0x9] sm:$0xff] %v2139_v3 }
 0x2f6   : > { %2148 = vst [vmem:[#allocation4 + $0x1] sm:$0xff] %v2138_v4  ;;  %v2199_v7 = vpack.c.bf16 %v2139_v3, %v2138_v4 }
 0x2f8   : > { %4289 = vmatmul.mubr.bf16.vlgmr.msra.gmra.mrb[20].mxu0 %v2199_v7 }
 0x2f9   : > { %4345 = vmatpush3.bf16.msra.mxu0 %v4656_v5  ;;  %4292 = vmatprep.mubr.msk.bf16.mxu0 %vm4704_vm1, %v4703_v2 }
 0x2fa   : > { %4346 = vmatprep.subr.bf16.mxu0 %v4703_v2 }
 0x2fd   : > { %v2158_v46 = vld [vmem:[#allocation4] sm:$0xff]  ;;  %v2159_v50 = vld [vmem:[#allocation4 + $0x8] sm:$0xff]  ;;  %4347 = vmatpush3.bf16.msra.mxu0 %v4657_v8 }
 0x2fe   : > { %v2168_v11 = vpack.c.bf16 %v2159_v50, %v2158_v46  ;;  %4348 = vmatprep.subr.bf16.mxu0 %v4703_v2  ;;  %v2463_v4 = vld [vmem:[#allocation4 + $0x2] sm:$0xff] }
 0x300   : > { %4325 = vmatmul.mubr.bf16.vlgmr.msra.gmra.mrb[20].mxu1 %v2168_v11 }
 0x301   : > { %v2106_v13 = vpop.permute.xlu1 %2105  ;;  %4328 = vmatprep.mubr.msk.bf16.mxu1 %vm4704_vm1, %v4703_v2  ;;  %4349 = vmatpush3.bf16.msra.mxu0 %v4658_v9 }
 0x302   : > { %v2101_v15 = vpop.permute.xlu0 %2100  ;;  %4350 = vmatprep.subr.bf16.mxu0 %v4703_v2 }
 0x305   : > { %v2045_v16 = vpop.permute.xlu1 %2044  ;;  %4351 = vmatpush3.bf16.msra.mxu0 %v4659_v14 }
 0x306   : > { %v2071_v18 = vmax.f32 %v5190_v1, %v2045_v16  ;;  %v2043_v19 = vpop.permute.xlu0 %2042  ;;  %4352 = vmatprep.subr.bf16.mxu0 %v4703_v2 }
 0x307   : > { %v2070_v20 = vmax.f32 %v5192_v6, %v2043_v19  ;;  %v4662_v6 = vld [vmem:[%s5626_s5 + $0xb0] sm:$0xff]   ;;  %v4664_v19 = vld [vmem:[%s5628_s7 + $0x20] sm:$0xff]  }
 0x308   : > { %v2141_v21 = vmul.f32 %v2106_v13, %v2071_v18  ;;  %4381 = vmatpush3.bf16.msra.mxu1 %v4664_v19 }
 0x309   : > { %v2140_v22 = vmul.f32 %v2101_v15, %v2070_v20  ;;  %v2116_v23 = vpop.permute.xlu1 %2115  ;;  %4353 = vmatpush3.bf16.msra.mxu0 %v4660_v17  ;;  %4382 = vmatprep.subr.bf16.mxu1 %v4703_v2  ;;  %v4665_v20 = vld [vmem:[%s5628_s7 + $0x28] sm:$0xff]  }
 0x30a   : > { %2151 = vst [vmem:[#allocation4 + $0x19] sm:$0xff] %v2141_v21  ;;  %v2111_v25 = vpop.permute.xlu0 %2110  ;;  %4354 = vmatprep.subr.bf16.mxu0 %v4703_v2 }
 0x30b   : > { %2150 = vst [vmem:[#allocation4 + $0x11] sm:$0xff] %v2140_v22  ;;  %v2200_v27 = vpack.c.bf16 %v2141_v21, %v2140_v22  ;;  %v4667_v21 = vld [vmem:[%s5628_s7] sm:$0xff]   ;;  %v4668_v22 = vld [vmem:[%s5628_s7 + $0x8] sm:$0xff]  }
 0x30c   : > { %4383 = vmatpush3.bf16.msra.mxu1 %v4665_v20 }
 0x30d   : > { %v2049_v1 = vpop.permute.xlu1 %2048  ;;  %4293 = vmatmul.mubr.bf16.gmra.mrb[24].mxu0 %v2200_v27  ;;  %4384 = vmatprep.subr.bf16.mxu1 %v4703_v2  ;;  %v4671_v27 = vld [vmem:[%s5628_s7 + $0x18] sm:$0xff]  }
 0x30e   : > { %v2073_v29 = vmax.f32 %v5214_v24, %v2049_v1  ;;  %v2047_v30 = vpop.permute.xlu0 %2046  ;;  %4296 = vmatprep.mubr.msk.bf16.mxu0 %vm4704_vm1, %v4703_v2  ;;  %4355 = vmatpush3.bf16.msra.mxu0 %v4661_v26  ;;  %v4669_v26 = vld [vmem:[%s5628_s7 + $0x38] sm:$0xff]  }
 0x30f   : > { %v2072_v31 = vmax.f32 %v5216_v28, %v2047_v30  ;;  %4356 = vmatprep.subr.bf16.mxu0 %v4703_v2 }
 0x310   : > { %v2143_v32 = vmul.f32 %v2116_v23, %v2073_v29  ;;  %v4666_v23 = vld [vmem:[%s5628_s7 + $0x30] sm:$0xff]  }
 0x311   : > { %v2142_v33 = vmul.f32 %v2111_v25, %v2072_v31  ;;  %v2126_v34 = vpop.permute.xlu1 %2125  ;;  %4385 = vmatpush3.bf16.msra.mxu1 %v4666_v23  ;;  %v4670_v25 = vld [vmem:[%s5628_s7 + $0x10] sm:$0xff]  }
 0x312   : > { %2153 = vst [vmem:[#allocation4 + $0x29] sm:$0xff] %v2143_v32  ;;  %v2121_v35 = vpop.permute.xlu0 %2120  ;;  %v2160_v36 = vld [vmem:[#allocation4 + $0x10] sm:$0xff]  ;;  %v2161_v24 = vld [vmem:[#allocation4 + $0x18] sm:$0xff]  ;;  %4357 = vmatpush3.bf16.msra.mxu0 %v4662_v6  ;;  %4386 = vmatprep.subr.bf16.mxu1 %v4703_v2 }
 0x313   : > { %2152 = vst [vmem:[#allocation4 + $0x21] sm:$0xff] %v2142_v33  ;;  %v2169_v37 = vpack.c.bf16 %v2161_v24, %v2160_v36  ;;  %v2201_v38 = vpack.c.bf16 %v2143_v32, %v2142_v33  ;;  %4358 = vmatprep.subr.bf16.mxu0 %v4703_v2  ;;  %v2465_v8 = vld [vmem:[#allocation4 + $0x12] sm:$0xff] }
 0x315   : > { %4329 = vmatmul.mubr.bf16.gmra.mrb[24].mxu1 %v2169_v37  ;;  %v2053_v28 = vpop.permute.xlu1 %2052  ;;  %4297 = vmatmul.mubr.bf16.gmra.mrb[28].mxu0 %v2201_v38 }
 0x316   : > { %v2075_v40 = vmax.f32 %v5232_v44, %v2053_v28  ;;  %v2051_v41 = vpop.permute.xlu0 %2050  ;;  %4332 = vmatprep.mubr.msk.bf16.mxu1 %vm4704_vm1, %v4703_v2  ;;  %4300 = vmatprep.mubr.msk.bf16.mxu0 %vm4704_vm1, %v4703_v2 }
 0x317   : > { %v2074_v42 = vmax.f32 %v5234_v48, %v2051_v41  ;;  %4359 = vmatpush3.bf16.msra.mxu0 %v4663_v39  ;;  %4387 = vmatpush3.bf16.msra.mxu1 %v4669_v26 }
 0x318   : > { %v2145_v43 = vmul.f32 %v2126_v34, %v2075_v40  ;;  %4408 = vmatprep.subr.bf16.mxu0 %v4703_v2  ;;  %4436 = vmatprep.subr.bf16.mxu1 %v4703_v2 }
 0x319   : > { %v2144_v45 = vmul.f32 %v2121_v35, %v2074_v42  ;;  %v2136_v47 = vpop.permute.xlu1 %2135 }
 0x31a   : > { %2155 = vst [vmem:[#allocation4 + $0x39] sm:$0xff] %v2145_v43  ;;  %v2131_v12 = vpop.permute.xlu0 %2130  ;;  %v2162_v49 = vld [vmem:[#allocation4 + $0x20] sm:$0xff]  ;;  %v2163_v51 = vld [vmem:[#allocation4 + $0x28] sm:$0xff] }
 0x31b   : > { %2154 = vst [vmem:[#allocation4 + $0x31] sm:$0xff] %v2144_v45  ;;  %v2170_v44 = vpack.c.bf16 %v2163_v51, %v2162_v49  ;;  %v2202_v52 = vpack.c.bf16 %v2145_v43, %v2144_v45  ;;  %v2466_v7 = vld [vmem:[#allocation4 + $0x1a] sm:$0xff]  ;;  %v2467_v9 = vld [vmem:[#allocation4 + $0x22] sm:$0xff] }
 0x31c   : > { %v2474_v46 = vpack.c.bf16 %v2466_v7, %v2465_v8 }
 0x31d   : > { %4333 = vmatmul.mubr.bf16.gmra.mrb[28].mxu1 %v2170_v44  ;;  %v2057_v54 = vpop.permute.xlu1 %2056  ;;  %4301 = vmatmul.mubr.bf16.gmra.mrb[32].mxu0 %v2202_v52 }
 0x31e   : > { %v2077_v56 = vmax.f32 %v5246_v53, %v2057_v54  ;;  %v2055_v58 = vpop.permute.xlu0 %2054  ;;  %4336 = vmatprep.mubr.msk.bf16.mxu1 %vm4704_vm1, %v4703_v2  ;;  %4304 = vmatprep.mubr.msk.bf16.mxu0 %vm4704_vm1, %v4703_v2 }
 0x31f   : > { %v2076_v48 = vmax.f32 %v5248_v57, %v2055_v58  ;;  %v2464_v57 = vld [vmem:[#allocation4 + $0xa] sm:$0xff] }
 0x320   : > { %v2147_v59 = vmul.f32 %v2136_v47, %v2077_v56  ;;  %v2473_v5 = vpack.c.bf16 %v2464_v57, %v2463_v4 }
 0x321   : > { %v2146_v60 = vmul.f32 %v2131_v12, %v2076_v48 }
 0x322   : > { %2157 = vst [vmem:[#allocation4 + $0x49] sm:$0x7f] %v2147_v59  ;;  %v2164_v61 = vld [vmem:[#allocation4 + $0x30] sm:$0xff]  ;;  %v2165_v62 = vld [vmem:[#allocation4 + $0x38] sm:$0xff] }
 0x323   : > { %2156 = vst [vmem:[#allocation4 + $0x41] sm:$0xff] %v2146_v60  ;;  %v2171_v63 = vpack.c.bf16 %v2165_v62, %v2164_v61  ;;  %v2468_v50 = vld [vmem:[#allocation4 + $0x2a] sm:$0xff]  ;;  %v2469_v14 = vld [vmem:[#allocation4 + $0x32] sm:$0xff] }
 0x324   : > { %v2475_v11 = vpack.c.bf16 %v2468_v50, %v2467_v9 }
 0x325   : > { %4337 = vmatmul.mubr.bf16.gmra.mrb[32].mxu1 %v2171_v63 }
 0x326   : > { %4340 = vmatprep.mubr.msk.bf16.mxu1 %vm4704_vm1, %v4703_v2 }
 0x329   : > { %v2198_v53 = vld [vmem:[#allocation4 + $0x49] sm:$0x3f] }
 0x32a   : > { %v2203_v0 = vpack.c.bf16 %v2198_v53, %v2146_v60  ;;  %v2166_v55 = vld [vmem:[#allocation4 + $0x40] sm:$0xff]  ;;  %v2167_v10 = vld [vmem:[#allocation4 + $0x48] sm:$0x3f] }
 0x32b   : > { %v2172_v3 = vpack.c.bf16 %v2167_v10, %v2166_v55  ;;  %v2470_v13 = vld [vmem:[#allocation4 + $0x3a] sm:$0xff]  ;;  %v2471_v16 = vld [vmem:[#allocation4 + $0x42] sm:$0xff]  ;;  %v2472_v17 = vld [vmem:[#allocation4 + $0x4a] sm:$0x3f] }
 0x32c   : > { %4305 = vmatmul.mubr.bf16.gmra.mrb[36].mxu0 %v2203_v0  ;;  %v2476_v15 = vpack.c.bf16 %v2470_v13, %v2469_v14  ;;  %v2477_v18 = vpack.c.bf16 %v2472_v17, %v2471_v16 }
 0x32d   : > { %4341 = vmatmul.mubr.bf16.gmra.mrb[36].mxu1 %v2172_v3  ;;  %4360 = vmatprep.mubr.msk.bf16.mxu0 %vm4704_vm1, %v4703_v2 }
 0x32e   : > { %4388 = vmatprep.mubr.msk.bf16.mxu1 %vm4704_vm1, %v4703_v2 }
 0x334   : > { %4361 = vmatmul.mubr.bf16.vlgmr.msra.gmra.mrb[40].mxu0 %v2473_v5 }
 0x335   : > { %4364 = vmatprep.mubr.msk.bf16.mxu0 %vm4704_vm1, %v4703_v2  ;;  %4409 = vmatpush3.bf16.msra.mxu0 %v4667_v21 }
 0x336   : > { %4410 = vmatprep.subr.bf16.mxu0 %v4703_v2 }
 0x339   : > { %4411 = vmatpush3.bf16.msra.mxu0 %v4668_v22 }
 0x33a   : > { %4412 = vmatprep.subr.bf16.mxu0 %v4703_v2 }
 0x33c   : > { %4365 = vmatmul.mubr.bf16.gmra.mrb[44].mxu0 %v2474_v46 }
 0x33d   : > { %4368 = vmatprep.mubr.msk.bf16.mxu0 %vm4704_vm1, %v4703_v2  ;;  %4413 = vmatpush3.bf16.msra.mxu0 %v4670_v25  ;;  %v2666_v25 = vpop.permute.xlu0 %2665 }
 0x33e   : > { %4414 = vmatprep.subr.bf16.mxu0 %v4703_v2 }
 0x341   : > { %4415 = vmatpush3.bf16.msra.mxu0 %v4671_v27 }
 0x342   : > { %4464 = vmatprep.subr.bf16.mxu0 %v4703_v2 }
 0x344   : > { %4369 = vmatmul.mubr.bf16.gmra.mrb[48].mxu0 %v2475_v11 }
 0x345   : > { %4372 = vmatprep.mubr.msk.bf16.mxu0 %vm4704_vm1, %v4703_v2 }
 0x34c   : > { %4373 = vmatmul.mubr.bf16.gmra.mrb[52].mxu0 %v2476_v15  ;;  %v5386_v15 = vld [vmem:[%s5627_s6] ss:$0 sm:$0xff] }
 0x34d   : > { %4376 = vmatprep.mubr.msk.bf16.mxu0 %vm4704_vm1, %v4703_v2 }
 0x354   : > { %4377 = vmatmul.mubr.bf16.gmra.mrb[56].mxu0 %v2477_v18 }
 0x355   : > { %4416 = vmatprep.mubr.msk.bf16.mxu0 %vm4704_vm1, %v4703_v2 }
 0x3cb   : > { %v2303_v1 = vpop.f32.mrb[20].mxu0 }
 0x3cc   : > { %v4290_v29 = vpop.f32.mrb[21].mxu0 }
 0x3cd   : > { %v2306_v30 = vpop.f32.mrb[22].mxu0 }
 0x3ce   : > { %v4291_v6 = vpop.f32.mrb[23].mxu0 }
 0x3d3   : > { %v2424_v31 = vpop.f32.mrb[20].mxu1 }
 0x3d4   : > { %v2425_v32 = vadd.f32 %v2424_v31, %v2303_v1  ;;  %v4326_v33 = vpop.f32.mrb[21].mxu1  ;;  %v2671_v1 = vpop.permute.xlu1 %2670 }
 0x3d5   : > { %v2427_v34 = vpop.f32.mrb[22].mxu1 }
 0x3d6   : > { %v2428_v35 = vadd.f32 %v2427_v34, %v2306_v30  ;;  %v4327_v36 = vpop.f32.mrb[23].mxu1 }
 0x3e0   : > { %v2311_v24 = vpop.f32.mrb[24].mxu0 }
 0x3e1   : > { %v4294_v37 = vpop.f32.mrb[25].mxu0 }
 0x3e2   : > { %v2314_v38 = vpop.f32.mrb[26].mxu0  ;;  %v2676_v37 = vpop.permute.xlu0 %2675 }
 0x3e3   : > { %v4295_v39 = vpop.f32.mrb[27].mxu0 }
 0x3e8   : > { %v2432_v28 = vpop.f32.mrb[24].mxu1  ;;  %v2319_v40 = vpop.f32.mrb[28].mxu0 }
 0x3e9   : > { %v2433_v41 = vadd.f32 %v2432_v28, %v2311_v24  ;;  %v4330_v42 = vpop.f32.mrb[25].mxu1  ;;  %v4298_v43 = vpop.f32.mrb[29].mxu0 }
 0x3ea   : > { %v2435_v45 = vpop.f32.mrb[26].mxu1  ;;  %v2322_v47 = vpop.f32.mrb[30].mxu0 }
 0x3eb   : > { %v2436_v12 = vadd.f32 %v2435_v45, %v2314_v38  ;;  %v4331_v49 = vpop.f32.mrb[27].mxu1  ;;  %v4299_v51 = vpop.f32.mrb[31].mxu0 }
 0x3ec   : > { %v2681_v28 = vpop.permute.xlu1 %2680 }
 0x3f0   : > { %v2440_v44 = vpop.f32.mrb[28].mxu1  ;;  %v2327_v52 = vpop.f32.mrb[32].mxu0 }
 0x3f1   : > { %v2441_v54 = vadd.f32 %v2440_v44, %v2319_v40  ;;  %v4334_v56 = vpop.f32.mrb[29].mxu1  ;;  %v4302_v58 = vpop.f32.mrb[33].mxu0 }
 0x3f2   : > { %v2443_v48 = vpop.f32.mrb[30].mxu1  ;;  %v2330_v59 = vpop.f32.mrb[34].mxu0 }
 0x3f3   : > { %v5373_v60 = vadd.f32 %v2443_v48, %v2322_v47  ;;  %v4335_v61 = vpop.f32.mrb[31].mxu1  ;;  %v4303_v62 = vpop.f32.mrb[35].mxu0  ;;  %v4672_v47 = vld [vmem:[%s5628_s7 + $0x40] sm:$0xff]  }
 0x3f4   : > { %v2686_v62 = vpop.permute.xlu0 %2685 }
 0x3f8   : > { %v2448_v63 = vpop.f32.mrb[32].mxu1 }
 0x3f9   : > { %v5375_v53 = vadd.f32 %v2448_v63, %v2327_v52  ;;  %v4338_v0 = vpop.f32.mrb[33].mxu1  ;;  %v4673_v63 = vld [vmem:[%s5628_s7 + $0x48] sm:$0xff]  }
 0x3fa   : > { %v2451_v55 = vpop.f32.mrb[34].mxu1 }
 0x3fb   : > { %v5377_v10 = vadd.f32 %v2451_v55, %v2330_v59  ;;  %v4339_v3 = vpop.f32.mrb[35].mxu1  ;;  %v2691_v55 = vpop.permute.xlu1 %2690 }
 0x3ff   : > { %v2335_v57 = vpop.f32.mrb[36].mxu0 }
 0x400   : > { %v2456_v4 = vpop.f32.mrb[36].mxu1  ;;  %v4306_v5 = vpop.f32.mrb[37].mxu0 }
 0x401   : > { %v5379_v7 = vadd.f32 %v2456_v4, %v2335_v57  ;;  %v4342_v8 = vpop.f32.mrb[37].mxu1  ;;  %v2338_v46 = vpop.f32.mrb[38].mxu0 }
 0x402   : > { %v2459_v50 = vpop.f32.mrb[38].mxu1  ;;  %v4307_v9 = vpop.f32.mrb[39].mxu0 }
 0x403   : > { %v5381_v11 = vadd.f32 %v2459_v50, %v2338_v46  ;;  %v4343_v13 = vpop.f32.mrb[39].mxu1 }
 0x407   : > { %v2577_v14 = vpop.f32.mrb[40].mxu0 }
 0x408   : > { %v2616_v16 = vadd.f32 %v2577_v14, %v2425_v32  ;;  %v4362_v17 = vpop.f32.mrb[41].mxu0 }
 0x409   : > { %v2580_v18 = vpop.f32.mrb[42].mxu0 }
 0x40a   : > { %v2633_v19 = vadd.f32 %v5386_v15, %v2616_v16  ;;  %v2617_v20 = vadd.f32 %v2580_v18, %v2428_v35  ;;  %v4363_v21 = vpop.f32.mrb[43].mxu0 }
 0x40c   : > { %v2643_v22 = vmax.f32 %v2633_v19, 0.0  ;;  %v2634_v23 = vadd.f32 %v5386_v15, %v2617_v20 }
 0x40e   : > { %v2713_v26 = vmul.f32 %v2666_v25, %v2643_v22  ;;  %v2644_v27 = vmax.f32 %v2634_v23, 0.0  ;;  %v2696_v22 = vpop.permute.xlu0 %2695  ;;  %v4675_v25 = vld [vmem:[%s5628_s7 + $0x58] sm:$0xff]  }
 0x40f   : > { %v2585_v29 = vpop.f32.mrb[44].mxu0 }
 0x410   : > { %2724 = vst.msk [vmem:[#allocation5 + $0x1] sm:$0xff] %vm2723_vm3, %v2713_v26  ;;  %v2714_v30 = vmul.f32 %v2671_v1, %v2644_v27  ;;  %v2618_v6 = vadd.f32 %v2585_v29, %v2433_v41  ;;  %v4366_v31 = vpop.f32.mrb[45].mxu0  ;;  %v2701_v26 = vpop.permute.xlu1 %2700 }
 0x411   : > { %v2588_v32 = vpop.f32.mrb[46].mxu0 }
 0x412   : > { %2725 = vst.msk [vmem:[#allocation5 + $0x9] sm:$0xff] %vm2723_vm3, %v2714_v30  ;;  %v2635_v33 = vadd.f32 %v5386_v15, %v2618_v6  ;;  %v2619_v34 = vadd.f32 %v2588_v32, %v2436_v12  ;;  %v4367_v35 = vpop.f32.mrb[47].mxu0 }
 0x414   : > { %v2645_v36 = vmax.f32 %v2635_v33, 0.0  ;;  %v2636_v24 = vadd.f32 %v5386_v15, %v2619_v34 }
 0x416   : > { %v2715_v38 = vmul.f32 %v2676_v37, %v2645_v36  ;;  %v2646_v39 = vmax.f32 %v2636_v24, 0.0 }
 0x417   : > { %v2593_v40 = vpop.f32.mrb[48].mxu0  ;;  %v2758_v45 = vld [vmem:[#allocation5 + $0x1] sm:$0xff] }
 0x418   : > { %2726 = vst.msk [vmem:[#allocation5 + $0x11] sm:$0xff] %vm2723_vm3, %v2715_v38  ;;  %v2716_v42 = vmul.f32 %v2681_v28, %v2646_v39  ;;  %v2620_v41 = vadd.f32 %v2593_v40, %v2441_v54  ;;  %v4370_v43 = vpop.f32.mrb[49].mxu0  ;;  %v2735_v51 = vld [vmem:[#allocation5] sm:$0xff]  ;;  %v2706_v28 = vpop.permute.xlu0 %2705 }
 0x419   : > { %v2596_v12 = vpop.f32.mrb[50].mxu0  ;;  %v2759_v49 = vld [vmem:[#allocation5 + $0x9] sm:$0xff] }
 0x41a   : > { %v2736_v44 = vld [vmem:[#allocation5 + $0x8] sm:$0xff]  ;;  %2727 = vst.msk [vmem:[#allocation5 + $0x19] sm:$0xff] %vm2723_vm3, %v2716_v42  ;;  %v2637_v52 = vadd.f32 %v5386_v15, %v2620_v41  ;;  %v2621_v56 = vadd.f32 %v2596_v12, %v5373_v60  ;;  %v4371_v58 = vpop.f32.mrb[51].mxu0  ;;  %v2768_v48 = vpack.c.bf16 %v2759_v49, %v2758_v45  ;;  %v2711_v42 = vpop.permute.xlu1 %2710 }
 0x41b   : > { %v2745_v59 = vpack.c.bf16 %v2736_v44, %v2735_v51 }
 0x41c   : > { %v2647_v54 = vmax.f32 %v2637_v52, 0.0  ;;  %v2638_v61 = vadd.f32 %v5386_v15, %v2621_v56  ;;  %4389 = vmatmul.mubr.msk.bf16.vlgmr.msra.gmra.mrb[40].mxu1 %vm2723_vm3, %v2768_v48 }
 0x41d   : > { %4417 = vmatmul.mubr.msk.bf16.vlgmr.msra.gmra.mrb[60].mxu0 %vm2723_vm3, %v2745_v59  ;;  %4437 = vmatpush3.bf16.msra.mxu1 %v4672_v47 }
 0x41e   : > { %4392 = vmatprep.mubr.msk.bf16.mxu1 %vm4704_vm1, %v4703_v2  ;;  %v2717_v60 = vmul.f32 %v2686_v62, %v2647_v54  ;;  %v2648_v0 = vmax.f32 %v2638_v61, 0.0  ;;  %4420 = vmatprep.mubr.msk.bf16.mxu0 %vm4704_vm1, %v4703_v2  ;;  %v3006_v54 = vld [vmem:[#allocation5 + $0x2] sm:$0xff] }
 0x41f   : > { %4438 = vmatprep.subr.bf16.mxu1 %v4703_v2  ;;  %v2601_v3 = vpop.f32.mrb[52].mxu0  ;;  %v2760_v8 = vld [vmem:[#allocation5 + $0x11] sm:$0xff] }
 0x420   : > { %2728 = vst.msk [vmem:[#allocation5 + $0x21] sm:$0xff] %vm2723_vm3, %v2717_v60  ;;  %v2718_v57 = vmul.f32 %v2691_v55, %v2648_v0  ;;  %v2622_v4 = vadd.f32 %v2601_v3, %v5375_v53  ;;  %v4374_v5 = vpop.f32.mrb[53].mxu0  ;;  %v2737_v9 = vld [vmem:[#allocation5 + $0x10] sm:$0xff]  ;;  %v4674_v53 = vld [vmem:[%s5628_s7 + $0x50] sm:$0xff]  }
 0x421   : > { %v2604_v46 = vpop.f32.mrb[54].mxu0  ;;  %v2761_v50 = vld [vmem:[#allocation5 + $0x19] sm:$0xff]  ;;  %4439 = vmatpush3.bf16.msra.mxu1 %v4673_v63  ;;  %v3007_v59 = vld [vmem:[#allocation5 + $0xa] sm:$0xff] }
 0x422   : > { %v2738_v13 = vld [vmem:[#allocation5 + $0x18] sm:$0xff]  ;;  %2729 = vst.msk [vmem:[#allocation5 + $0x29] sm:$0xff] %vm2723_vm3, %v2718_v57  ;;  %v2639_v14 = vadd.f32 %v5386_v15, %v2622_v4  ;;  %v2623_v16 = vadd.f32 %v2604_v46, %v5377_v10  ;;  %v4375_v17 = vpop.f32.mrb[55].mxu0  ;;  %v2769_v18 = vpack.c.bf16 %v2761_v50, %v2760_v8  ;;  %4440 = vmatprep.subr.bf16.mxu1 %v4703_v2 }
 0x423   : > { %v2746_v19 = vpack.c.bf16 %v2738_v13, %v2737_v9  ;;  %v3016_v61 = vpack.c.bf16 %v3007_v59, %v3006_v54  ;;  %v3008_v63 = vld [vmem:[#allocation5 + $0x12] sm:$0xff] }
 0x424   : > { %v2649_v20 = vmax.f32 %v2639_v14, 0.0  ;;  %v2640_v21 = vadd.f32 %v5386_v15, %v2623_v16  ;;  %4393 = vmatmul.mubr.msk.bf16.gmra.mrb[44].mxu1 %vm2723_vm3, %v2769_v18 }
 0x425   : > { %4421 = vmatmul.mubr.msk.bf16.gmra.mrb[64].mxu0 %vm2723_vm3, %v2746_v19  ;;  %4396 = vmatprep.mubr.msk.bf16.mxu1 %vm4704_vm1, %v4703_v2 }
 0x426   : > { %4424 = vmatprep.mubr.msk.bf16.mxu0 %vm4704_vm1, %v4703_v2  ;;  %v2719_v10 = vmul.f32 %v2696_v22, %v2649_v20  ;;  %v2650_v23 = vmax.f32 %v2640_v21, 0.0  ;;  %4441 = vmatpush3.bf16.msra.mxu1 %v4674_v53 }
 0x427   : > { %v2609_v27 = vpop.f32.mrb[56].mxu0  ;;  %4442 = vmatprep.subr.bf16.mxu1 %v4703_v2  ;;  %v2762_v6 = vld [vmem:[#allocation5 + $0x21] sm:$0xff] }
 0x428   : > { %2730 = vst.msk [vmem:[#allocation5 + $0x31] sm:$0xff] %vm2723_vm3, %v2719_v10  ;;  %v2720_v1 = vmul.f32 %v2701_v26, %v2650_v23  ;;  %v2624_v29 = vadd.f32 %v2609_v27, %v5379_v7  ;;  %v4378_v30 = vpop.f32.mrb[57].mxu0  ;;  %v2739_v33 = vld [vmem:[#allocation5 + $0x20] sm:$0xff] }
 0x429   : > { %v2612_v31 = vpop.f32.mrb[58].mxu0  ;;  %v2763_v32 = vld [vmem:[#allocation5 + $0x29] sm:$0xff]  ;;  %v3009_v62 = vld [vmem:[#allocation5 + $0x1a] sm:$0xff] }
 0x42a   : > { %v2740_v34 = vld [vmem:[#allocation5 + $0x28] sm:$0xff]  ;;  %2731 = vst.msk [vmem:[#allocation5 + $0x39] sm:$0xff] %vm2723_vm3, %v2720_v1  ;;  %v2641_v35 = vadd.f32 %v5386_v15, %v2624_v29  ;;  %v2625_v36 = vadd.f32 %v2612_v31, %v5381_v11  ;;  %v4379_v24 = vpop.f32.mrb[59].mxu0  ;;  %v2770_v37 = vpack.c.bf16 %v2763_v32, %v2762_v6  ;;  %4443 = vmatpush3.bf16.msra.mxu1 %v4675_v25 }
 0x42b   : > { %v2747_v38 = vpack.c.bf16 %v2740_v34, %v2739_v33  ;;  %4488 = vmatprep.subr.bf16.mxu1 %v4703_v2  ;;  %v3017_v60 = vpack.c.bf16 %v3009_v62, %v3008_v63  ;;  %v3010_v55 = vld [vmem:[#allocation5 + $0x22] sm:$0xff]  ;;  %v5485_v62 = vld [vmem:[%s5629_s8] ss:$0 sm:$0xff] }
 0x42c   : > { %v2651_v39 = vmax.f32 %v2641_v35, 0.0  ;;  %v2642_v7 = vadd.f32 %v5386_v15, %v2625_v36  ;;  %4397 = vmatmul.mubr.msk.bf16.gmra.mrb[48].mxu1 %vm2723_vm3, %v2770_v37 }
 0x42d   : > { %4425 = vmatmul.mubr.msk.bf16.gmra.mrb[68].mxu0 %vm2723_vm3, %v2747_v38  ;;  %4400 = vmatprep.mubr.msk.bf16.mxu1 %vm4704_vm1, %v4703_v2 }
 0x42e   : > { %4428 = vmatprep.mubr.msk.bf16.mxu0 %vm4704_vm1, %v4703_v2  ;;  %v2721_v11 = vmul.f32 %v2706_v28, %v2651_v39  ;;  %v2652_v40 = vmax.f32 %v2642_v7, 0.0 }
 0x42f   : > { %v2764_v43 = vld [vmem:[#allocation5 + $0x31] sm:$0xff] }
 0x430   : > { %2732 = vst.msk [vmem:[#allocation5 + $0x41] sm:$0xff] %vm2723_vm3, %v2721_v11  ;;  %v2722_v41 = vmul.f32 %v2711_v42, %v2652_v40  ;;  %v2741_v45 = vld [vmem:[#allocation5 + $0x30] sm:$0xff] }
 0x431   : > { %v2765_v15 = vld [vmem:[#allocation5 + $0x39] sm:$0xff]  ;;  %v3011_v0 = vld [vmem:[#allocation5 + $0x2a] sm:$0xff] }
 0x432   : > { %v2742_v47 = vld [vmem:[#allocation5 + $0x38] sm:$0xff]  ;;  %2734 = vst.msk [vmem:[#allocation5 + $0x49] sm:$0x3f] %vm2733_vm4, %v2722_v41  ;;  %v2771_v12 = vpack.c.bf16 %v2765_v15, %v2764_v43  ;;  %v3018_v3 = vpack.c.bf16 %v3011_v0, %v3010_v55 }
 0x433   : > { %v2748_v49 = vpack.c.bf16 %v2742_v47, %v2741_v45  ;;  %v3012_v4 = vld [vmem:[#allocation5 + $0x32] sm:$0xff] }
 0x434   : > { %4401 = vmatmul.mubr.msk.bf16.gmra.mrb[52].mxu1 %vm2723_vm3, %v2771_v12 }
 0x435   : > { %4429 = vmatmul.mubr.msk.bf16.gmra.mrb[72].mxu0 %vm2723_vm3, %v2748_v49  ;;  %4404 = vmatprep.mubr.msk.bf16.mxu1 %vm4704_vm1, %v4703_v2 }
 0x436   : > { %4432 = vmatprep.mubr.msk.bf16.mxu0 %vm4704_vm1, %v4703_v2 }
 0x437   : > { %v2766_v51 = vld [vmem:[#allocation5 + $0x41] sm:$0xff] }
 0x438   : > { %v2743_v52 = vld [vmem:[#allocation5 + $0x40] sm:$0xff] }
 0x439   : > { %v2767_v44 = vld [vmem:[#allocation5 + $0x49] sm:$0x3f]  ;;  %v3013_v57 = vld [vmem:[#allocation5 + $0x3a] sm:$0xff] }
 0x43a   : > { %v2744_v56 = vld [vmem:[#allocation5 + $0x48] sm:$0x3f]  ;;  %v2772_v58 = vpack.c.bf16 %v2767_v44, %v2766_v51  ;;  %v3019_v5 = vpack.c.bf16 %v3013_v57, %v3012_v4 }
 0x43b   : > { %v2749_v48 = vpack.c.bf16 %v2744_v56, %v2743_v52  ;;  %v3014_v8 = vld [vmem:[#allocation5 + $0x42] sm:$0xff]  ;;  %v3015_v46 = vld [vmem:[#allocation5 + $0x4a] sm:$0x3f] }
 0x43c   : > { %4405 = vmatmul.mubr.msk.bf16.gmra.mrb[56].mxu1 %vm2723_vm3, %v2772_v58  ;;  %v3020_v50 = vpack.c.bf16 %v3015_v46, %v3014_v8 }
 0x43d   : > { %4433 = vmatmul.mubr.msk.bf16.gmra.mrb[76].mxu0 %vm2723_vm3, %v2749_v48  ;;  %4444 = vmatprep.mubr.msk.bf16.mxu1 %vm4704_vm1, %v4703_v2 }
 0x43e   : > { %4472 = vmatprep.mubr.msk.bf16.mxu0 %vm4704_vm1, %v4703_v2 }
 0x444   : > { %4445 = vmatmul.mubr.msk.bf16.vlgmr.msra.gmra.mrb[60].mxu1 %vm2723_vm3, %v3016_v61 }
 0x445   : > { %4448 = vmatprep.mubr.msk.bf16.mxu1 %vm4704_vm1, %v4703_v2 }
 0x44c   : > { %4449 = vmatmul.mubr.msk.bf16.gmra.mrb[64].mxu1 %vm2723_vm3, %v3017_v60 }
 0x44d   : > { %4452 = vmatprep.mubr.msk.bf16.mxu1 %vm4704_vm1, %v4703_v2 }
 0x454   : > { %4453 = vmatmul.mubr.msk.bf16.gmra.mrb[68].mxu1 %vm2723_vm3, %v3018_v3 }
 0x455   : > { %4456 = vmatprep.mubr.msk.bf16.mxu1 %vm4704_vm1, %v4703_v2 }
 0x45c   : > { %4457 = vmatmul.mubr.msk.bf16.gmra.mrb[72].mxu1 %vm2723_vm3, %v3019_v5 }
 0x45d   : > { %4460 = vmatprep.mubr.msk.bf16.mxu1 %vm4704_vm1, %v4703_v2 }
 0x464   : > { %4461 = vmatmul.mubr.msk.bf16.gmra.mrb[76].mxu1 %vm2723_vm3, %v3020_v50 }
 0x465   : > { %4496 = vmatprep.mubr.msk.bf16.mxu1 %vm4704_vm1, %v4703_v2 }
 0x4ef   : > { %v2855_v9 = vpop.f32.mrb[40].mxu1 }
 0x4f0   : > { %v2967_v13 = vpop.f32.mrb[60].mxu0  ;;  %v4390_v16 = vpop.f32.mrb[41].mxu1 }
 0x4f1   : > { %v2968_v14 = vadd.f32 %v2967_v13, %v2855_v9  ;;  %v4418_v17 = vpop.f32.mrb[61].mxu0  ;;  %v2858_v18 = vpop.f32.mrb[42].mxu1 }
 0x4f2   : > { %v2970_v19 = vpop.f32.mrb[62].mxu0  ;;  %v4391_v20 = vpop.f32.mrb[43].mxu1 }
 0x4f3   : > { %v2971_v53 = vadd.f32 %v2970_v19, %v2858_v18  ;;  %v4419_v21 = vpop.f32.mrb[63].mxu0 }
 0x4f7   : > { %v2863_v22 = vpop.f32.mrb[44].mxu1 }
 0x4f8   : > { %v2975_v10 = vpop.f32.mrb[64].mxu0  ;;  %v4394_v25 = vpop.f32.mrb[45].mxu1 }
 0x4f9   : > { %v2976_v23 = vadd.f32 %v2975_v10, %v2863_v22  ;;  %v4422_v26 = vpop.f32.mrb[65].mxu0  ;;  %v2866_v27 = vpop.f32.mrb[46].mxu1 }
 0x4fa   : > { %v2978_v1 = vpop.f32.mrb[66].mxu0  ;;  %v4395_v30 = vpop.f32.mrb[47].mxu1  ;;  %v4676_v26 = vld [vmem:[%s5630_s9 + $0x20] sm:$0xff]  }
 0x4fb   : > { %v2979_v29 = vadd.f32 %v2978_v1, %v2866_v27  ;;  %v4423_v6 = vpop.f32.mrb[67].mxu0  ;;  %4465 = vmatpush3.bf16.msra.mxu0 %v4676_v26 }
 0x4fc   : > { %4466 = vmatprep.subr.bf16.mxu0 %v4703_v2 }
 0x4ff   : > { %v2871_v31 = vpop.f32.mrb[48].mxu1 }
 0x500   : > { %v2983_v32 = vpop.f32.mrb[68].mxu0  ;;  %v4398_v34 = vpop.f32.mrb[49].mxu1 }
 0x501   : > { %v2984_v33 = vadd.f32 %v2983_v32, %v2871_v31  ;;  %v4426_v35 = vpop.f32.mrb[69].mxu0  ;;  %v2874_v36 = vpop.f32.mrb[50].mxu1 }
 0x502   : > { %v2986_v24 = vpop.f32.mrb[70].mxu0  ;;  %v4399_v38 = vpop.f32.mrb[51].mxu1 }
 0x503   : > { %v2987_v37 = vadd.f32 %v2986_v24, %v2874_v36  ;;  %v4427_v39 = vpop.f32.mrb[71].mxu0  ;;  %v4677_v38 = vld [vmem:[%s5630_s9 + $0x28] sm:$0xff]  }
 0x504   : > { %4467 = vmatpush3.bf16.msra.mxu0 %v4677_v38 }
 0x505   : > { %4468 = vmatprep.subr.bf16.mxu0 %v4703_v2 }
 0x507   : > { %v2879_v7 = vpop.f32.mrb[52].mxu1 }
 0x508   : > { %v2991_v28 = vpop.f32.mrb[72].mxu0  ;;  %v4402_v40 = vpop.f32.mrb[53].mxu1 }
 0x509   : > { %v5474_v11 = vadd.f32 %v2991_v28, %v2879_v7  ;;  %v4430_v42 = vpop.f32.mrb[73].mxu0  ;;  %v2882_v41 = vpop.f32.mrb[54].mxu1 }
 0x50a   : > { %v2994_v43 = vpop.f32.mrb[74].mxu0  ;;  %v4403_v45 = vpop.f32.mrb[55].mxu1 }
 0x50b   : > { %v5476_v15 = vadd.f32 %v2994_v43, %v2882_v41  ;;  %v4431_v47 = vpop.f32.mrb[75].mxu0  ;;  %v4678_v41 = vld [vmem:[%s5630_s9 + $0x30] sm:$0xff]  }
 0x50c   : > { %4469 = vmatpush3.bf16.msra.mxu0 %v4678_v41 }
 0x50d   : > { %4470 = vmatprep.subr.bf16.mxu0 %v4703_v2 }
 0x50f   : > { %v2887_v12 = vpop.f32.mrb[56].mxu1 }
 0x510   : > { %v2999_v49 = vpop.f32.mrb[76].mxu0  ;;  %v4406_v44 = vpop.f32.mrb[57].mxu1 }
 0x511   : > { %v5478_v51 = vadd.f32 %v2999_v49, %v2887_v12  ;;  %v4434_v52 = vpop.f32.mrb[77].mxu0  ;;  %v2890_v56 = vpop.f32.mrb[58].mxu1 }
 0x512   : > { %v3002_v58 = vpop.f32.mrb[78].mxu0  ;;  %v4407_v59 = vpop.f32.mrb[59].mxu1 }
 0x513   : > { %v5480_v48 = vadd.f32 %v3002_v58, %v2890_v56  ;;  %v4435_v54 = vpop.f32.mrb[79].mxu0 }
 0x517   : > { %v3103_v61 = vpop.f32.mrb[60].mxu1 }
 0x518   : > { %v3142_v63 = vadd.f32 %v3103_v61, %v2968_v14  ;;  %v4446_v60 = vpop.f32.mrb[61].mxu1 }
 0x519   : > { %v3106_v0 = vpop.f32.mrb[62].mxu1 }
 0x51a   : > { %v3159_v55 = vadd.f32 %v5485_v62, %v3142_v63  ;;  %v3143_v3 = vadd.f32 %v3106_v0, %v2971_v53  ;;  %v4447_v57 = vpop.f32.mrb[63].mxu1  ;;  %v4679_v0 = vld [vmem:[%s5630_s9 + $0x40] sm:$0xff]  }
 0x51b   : > { %4489 = vmatpush3.bf16.msra.mxu1 %v4679_v0 }
 0x51c   : > { %v3169_v4 = vmax.f32 %v3159_v55, 0.0  ;;  %v3160_v5 = vadd.f32 %v5485_v62, %v3143_v3  ;;  %4490 = vmatprep.subr.bf16.mxu1 %v4703_v2  ;;  %v4681_v55 = vld [vmem:[%s5630_s9 + $0x38] sm:$0xff]   ;;  %v4682_v3 = vld [vmem:[%s5630_s9 + $0x50] sm:$0xff]  }
 0x51d   : > { %4471 = vmatpush3.bf16.msra.mxu0 %v4681_v55 }
 0x51e   : > { %3179 = vst.msk [vmem:[#allocation6] sm:$0xff] %vm2723_vm3, %v3169_v4  ;;  %v3170_v8 = vmax.f32 %v3160_v5, 0.0  ;;  %4476 = vmatprep.subr.bf16.mxu0 %v4703_v2 }
 0x51f   : > { %v3111_v46 = vpop.f32.mrb[64].mxu1 }
 0x520   : > { %3180 = vst.msk [vmem:[#allocation6 + $0x8] sm:$0xff] %vm2723_vm3, %v3170_v8  ;;  %v3144_v50 = vadd.f32 %v3111_v46, %v2976_v23  ;;  %v4450_v9 = vpop.f32.mrb[65].mxu1  ;;  %v4683_v8 = vld [vmem:[%s5630_s9 + $0x58] sm:$0xff]  }
 0x521   : > { %v3114_v13 = vpop.f32.mrb[66].mxu1 }
 0x522   : > { %v3161_v14 = vadd.f32 %v5485_v62, %v3144_v50  ;;  %v3145_v16 = vadd.f32 %v3114_v13, %v2979_v29  ;;  %v4451_v17 = vpop.f32.mrb[67].mxu1 }
 0x524   : > { %v3171_v18 = vmax.f32 %v3161_v14, 0.0  ;;  %v3162_v19 = vadd.f32 %v5485_v62, %v3145_v16 }
 0x526   : > { %3181 = vst.msk [vmem:[#allocation6 + $0x10] sm:$0xff] %vm2723_vm3, %v3171_v18  ;;  %v3172_v53 = vmax.f32 %v3162_v19, 0.0 }
 0x527   : > { %v3119_v20 = vpop.f32.mrb[68].mxu1  ;;  %v3189_v21 = vld [vmem:[#allocation6] ss:$2 sm:$0xff]  ;;  %v3199_v22 = vld [vmem:[#allocation6 + $0x1] ss:$2 sm:$0xff] }
 0x528   : > { %3182 = vst.msk [vmem:[#allocation6 + $0x18] sm:$0xff] %vm2723_vm3, %v3172_v53  ;;  %v3146_v10 = vadd.f32 %v3119_v20, %v2984_v33  ;;  %v4454_v25 = vpop.f32.mrb[69].mxu1  ;;  %v5495_v23 = vmax.f32 %v3189_v21, %v3199_v22 }
 0x529   : > { %v3122_v27 = vpop.f32.mrb[70].mxu1 }
 0x52a   : > { %v3163_v1 = vadd.f32 %v5485_v62, %v3146_v10  ;;  %v3147_v29 = vadd.f32 %v3122_v27, %v2987_v37  ;;  %3233 = vrot.lane.b32.xlu1 %v5495_v23, %s4706_s30  ;;  %3218 = vrot.lane.b32.xlu0 %v5495_v23, %s4705_s15  ;;  %v4455_v30 = vpop.f32.mrb[71].mxu1 }
 0x52c   : > { %v3173_v6 = vmax.f32 %v3163_v1, 0.0  ;;  %v3164_v31 = vadd.f32 %v5485_v62, %v3147_v29 }
 0x52e   : > { %3183 = vst.msk [vmem:[#allocation6 + $0x20] sm:$0xff] %vm2723_vm3, %v3173_v6  ;;  %v3174_v32 = vmax.f32 %v3164_v31, 0.0  ;;  %v4684_v6 = vld [vmem:[%s5630_s9] sm:$0xff]  }
 0x52f   : > { %v3127_v33 = vpop.f32.mrb[72].mxu1  ;;  %v3191_v34 = vld [vmem:[#allocation6 + $0x10] ss:$2 sm:$0xff]  ;;  %v3201_v35 = vld [vmem:[#allocation6 + $0x11] ss:$2 sm:$0xff] }
 0x530   : > { %3184 = vst.msk [vmem:[#allocation6 + $0x28] sm:$0xff] %vm2723_vm3, %v3174_v32  ;;  %v3148_v36 = vadd.f32 %v3127_v33, %v5474_v11  ;;  %v4458_v24 = vpop.f32.mrb[73].mxu1  ;;  %v5510_v37 = vmax.f32 %v3191_v34, %v3201_v35  ;;  %v4685_v34 = vld [vmem:[%s5630_s9 + $0x8] sm:$0xff]   ;;  %v4686_v35 = vld [vmem:[%s5630_s9 + $0x10] sm:$0xff]  }
 0x531   : > { %v3130_v39 = vpop.f32.mrb[74].mxu1 }
 0x532   : > { %v3165_v7 = vadd.f32 %v5485_v62, %v3148_v36  ;;  %v3149_v28 = vadd.f32 %v3130_v39, %v5476_v15  ;;  %3235 = vrot.lane.b32.xlu0 %v5510_v37, %s4706_s30  ;;  %3220 = vrot.lane.b32.xlu1 %v5510_v37, %s4705_s15  ;;  %v4459_v40 = vpop.f32.mrb[75].mxu1  ;;  %v4687_v36 = vld [vmem:[%s5630_s9 + $0x18] sm:$0xff]   ;;  %v4689_v39 = vld [vmem:[%s5630_s9 + $0x68] sm:$0xff]  }
 0x534   : > { %v3175_v11 = vmax.f32 %v3165_v7, 0.0  ;;  %v3166_v42 = vadd.f32 %v5485_v62, %v3149_v28  ;;  %v4690_v7 = vld [vmem:[%s5630_s9 + $0x70] sm:$0xff]   ;;  %v4691_v28 = vld [vmem:[%s5630_s9 + $0x78] sm:$0xff]  }
 0x536   : > { %3185 = vst.msk [vmem:[#allocation6 + $0x30] sm:$0xff] %vm2723_vm3, %v3175_v11  ;;  %v3176_v43 = vmax.f32 %v3166_v42, 0.0 }
 0x537   : > { %v3135_v15 = vpop.f32.mrb[76].mxu1  ;;  %v3193_v45 = vld [vmem:[#allocation6 + $0x20] ss:$2 sm:$0xff]  ;;  %v3203_v47 = vld [vmem:[#allocation6 + $0x21] ss:$2 sm:$0xff] }
 0x538   : > { %3186 = vst.msk [vmem:[#allocation6 + $0x38] sm:$0xff] %vm2723_vm3, %v3176_v43  ;;  %v3150_v12 = vadd.f32 %v3135_v15, %v5478_v51  ;;  %v4462_v49 = vpop.f32.mrb[77].mxu1  ;;  %v3210_v44 = vmax.f32 %v3193_v45, %v3203_v47 }
 0x539   : > { %v3138_v52 = vpop.f32.mrb[78].mxu1 }
 0x53a   : > { %v3167_v56 = vadd.f32 %v5485_v62, %v3150_v12  ;;  %v3151_v58 = vadd.f32 %v3138_v52, %v5480_v48  ;;  %3237 = vrot.lane.b32.xlu1 %v3210_v44, %s4706_s30  ;;  %3222 = vrot.lane.b32.xlu0 %v3210_v44, %s4705_s15  ;;  %v4463_v59 = vpop.f32.mrb[79].mxu1 }
 0x53c   : > { %v3177_v54 = vmax.f32 %v3167_v56, 0.0  ;;  %v3168_v61 = vadd.f32 %v5485_v62, %v3151_v58  ;;  %v4680_v62 = vld [vmem:[%s5630_s9 + $0x48] sm:$0xff]  }
 0x53d   : > { %4491 = vmatpush3.bf16.msra.mxu1 %v4680_v62 }
 0x53e   : > { %3187 = vst.msk [vmem:[#allocation6 + $0x40] sm:$0xff] %vm2723_vm3, %v3177_v54  ;;  %v3178_v51 = vmax.f32 %v3168_v61, 0.0  ;;  %4492 = vmatprep.subr.bf16.mxu1 %v4703_v2  ;;  %v3904_v61 = vld [vmem:[%s5631_s10] ss:$0 sm:$0xff] }
 0x53f   : > { %v3195_v63 = vld [vmem:[#allocation6 + $0x30] ss:$2 sm:$0xff]  ;;  %v3205_v60 = vld [vmem:[#allocation6 + $0x31] ss:$2 sm:$0xff] }
 0x540   : > { %3188 = vst.msk [vmem:[#allocation6 + $0x48] sm:$0x3f] %vm2733_vm4, %v3178_v51  ;;  %v3211_v48 = vmax.f32 %v3195_v63, %v3205_v60 }
 0x541   : > { %4493 = vmatpush3.bf16.msra.mxu1 %v4682_v3 }
 0x542   : > { %3224 = vrot.lane.b32.xlu1 %v3211_v48, %s4705_s15  ;;  %4494 = vmatprep.subr.bf16.mxu1 %v4703_v2 }
 0x545   : > { %4495 = vmatpush3.bf16.msra.mxu1 %v4683_v8 }
 0x547   : > { %v3197_v57 = vld [vmem:[#allocation6 + $0x40] ss:$2 sm:$0x7f]  ;;  %v3207_v4 = vld [vmem:[#allocation6 + $0x41] ss:$2 sm:$0x7f] }
 0x548   : > { %v3212_v5 = vmax.f32 %v3197_v57, %v3207_v4 }
 0x54a   : > { %3241 = vrot.lane.b32.xlu1 %v3212_v5, %s4706_s30  ;;  %3226 = vrot.lane.b32.xlu0 %v3212_v5, %s4705_s15 }
 0x54e   : > { %3239 = vrot.lane.b32.xlu0 %v3211_v48, %s4706_s30  ;;  %s3649_s30 = sshll.u32 %s5638_s26, 3 }
 0x54f   : > { %s440_s19 = scalar_lea.vmem %s5634_s13, %s3649_s30 }
 0x59c   : > { %v3234_v46 = vpop.permute.xlu1 %3233  ;;  %v3219_v50 = vpop.permute.xlu0 %3218 }
 0x59d   : > { %v3249_v9 = vsel %vm3248_vm5, %v3219_v50, %v3234_v46 }
 0x59e   : > { %v3254_v13 = vmax.f32 %v5495_v23, %v3249_v9 }
 0x5a0   : > { %3259 = vst.msk [vmem:[#allocation7] sm:$0xff] %vm2723_vm3, %v3254_v13 }
 0x5a4   : > { %v3236_v14 = vpop.permute.xlu0 %3235  ;;  %v3221_v16 = vpop.permute.xlu1 %3220 }
 0x5a5   : > { %v3250_v17 = vsel %vm3248_vm5, %v3221_v16, %v3236_v14 }
 0x5a6   : > { %v3255_v18 = vmax.f32 %v5510_v37, %v3250_v17  ;;  %v4688_v37 = vld [vmem:[%s5630_s9 + $0x60] sm:$0xff]  }
 0x5a8   : > { %3260 = vst.msk [vmem:[#allocation7 + $0x8] sm:$0xff] %vm2723_vm3, %v3255_v18 }
 0x5ac   : > { %v3238_v19 = vpop.permute.xlu1 %3237  ;;  %v3223_v53 = vpop.permute.xlu0 %3222 }
 0x5ad   : > { %v3251_v20 = vsel %vm3248_vm5, %v3223_v53, %v3238_v19 }
 0x5ae   : > { %v3256_v21 = vmax.f32 %v3210_v44, %v3251_v20 }
 0x5b0   : > { %3261 = vst.msk [vmem:[#allocation7 + $0x10] sm:$0xff] %vm2723_vm3, %v3256_v21 }
 0x5b4   : > { %v3225_v22 = vpop.permute.xlu1 %3224 }
 0x5bc   : > { %v3242_v10 = vpop.permute.xlu1 %3241  ;;  %v3227_v25 = vpop.permute.xlu0 %3226 }
 0x5bd   : > { %v3253_v23 = vsel %vm3248_vm5, %v3227_v25, %v3242_v10 }
 0x5be   : > { %v3258_v26 = vmax.f32 %v3212_v5, %v3253_v23 }
 0x5c0   : > { %3264 = vst.msk [vmem:[#allocation7 + $0x20] sm:$0x7f] %vm3263_vm6, %v3258_v26  ;;  %v3240_v27 = vpop.permute.xlu0 %3239 }
 0x5c1   : > { %v3252_v1 = vsel %vm3248_vm5, %v3225_v22, %v3240_v27 }
 0x5c2   : > { %v3257_v29 = vmax.f32 %v3211_v48, %v3252_v1 }
 0x5c4   : > { %3262 = vst.msk [vmem:[#allocation7 + $0x18] sm:$0xff] %vm2723_vm3, %v3257_v29 }
 0x5cb   : > { %v3276_v30 = vld [vmem:[#allocation7 + $0x1] ss:$5 sm:$0xff]  ;;  %v3422_v31 = vld [vmem:[#allocation7 + $0x2] ss:$5 sm:$0xff] }
 0x5cc   : > { %v3277_v32 = vpack.c.bf16 %v3276_v30, %v3276_v30  ;;  %v3423_v33 = vpack.c.bf16 %v3422_v31, %v3422_v31  ;;  %v3265_v24 = vld [vmem:[#allocation7] ss:$5 sm:$0xff] }
 0x5cd   : > { %v3266_v38 = vpack.c.bf16 %v3265_v24, %v3265_v24  ;;  %v3502_v40 = vld [vmem:[#allocation7 + $0x3] ss:$5 sm:$0xff] }
 0x5ce   : > { %4473 = vmatmul.mubr.msk.bf16.vlgmr.msra.gmra.mrb[80].mxu0 %vm2723_vm3, %v3277_v32  ;;  %4497 = vmatmul.mubr.msk.bf16.vlgmr.msra.gmra.mrb[80].mxu1 %vm2723_vm3, %v3423_v33  ;;  %v3503_v11 = vpack.c.bf16 %v3502_v40, %v3502_v40 }
 0x5cf   : > { %4477 = vmatpush3.bf16.msra.mxu0 %v4684_v6  ;;  %4484 = vmatprep.mubr.msk.bf16.mxu0 %vm4704_vm1, %v4703_v2 }
 0x5d0   : > { %4478 = vmatprep.subr.bf16.mxu0 %v4703_v2 }
 0x5d3   : > { %4479 = vmatpush3.bf16.msra.mxu0 %v4685_v34 }
 0x5d4   : > { %4480 = vmatprep.subr.bf16.mxu0 %v4703_v2 }
 0x5d7   : > { %4481 = vmatpush3.bf16.msra.mxu0 %v4686_v35 }
 0x5d8   : > { %4482 = vmatprep.subr.bf16.mxu0 %v4703_v2 }
 0x5db   : > { %4483 = vmatpush3.bf16.msra.mxu0 %v4687_v36 }
 0x5dc   : > { %4500 = vmatprep.subr.bf16.mxu0 %v4703_v2 }
 0x5de   : > { %4485 = vmatmul.mubr.msk.bf16.vlgmr.msra.gmra.mrb[84].mxu0 %vm2723_vm3, %v3266_v38 }
 0x5df   : > { %4501 = vmatpush3.bf16.msra.mxu0 %v4688_v37  ;;  %4508 = vmatprep.mubr.msk.bf16.mxu0 %vm4704_vm1, %v4703_v2 }
 0x5e0   : > { %4502 = vmatprep.subr.bf16.mxu0 %v4703_v2 }
 0x5e3   : > { %4503 = vmatpush3.bf16.msra.mxu0 %v4689_v39 }
 0x5e4   : > { %4504 = vmatprep.subr.bf16.mxu0 %v4703_v2 }
 0x5e7   : > { %4505 = vmatpush3.bf16.msra.mxu0 %v4690_v7 }
 0x5e8   : > { %4506 = vmatprep.subr.bf16.mxu0 %v4703_v2 }
 0x5eb   : > { %4507 = vmatpush3.bf16.msra.mxu0 %v4691_v28 }
 0x5ee   : > { %4509 = vmatmul.mubr.msk.bf16.vlgmr.msra.gmra.mrb[88].mxu0 %vm2723_vm3, %v3503_v11 }
 0x6a1   : > { %v3348_v42 = vpop.f32.mrb[80].mxu0  ;;  %v3494_v41 = vpop.f32.mrb[80].mxu1 }
 0x6a2   : > { %v4474_v43 = vpop.f32.mrb[81].mxu0  ;;  %v4498_v15 = vpop.f32.mrb[81].mxu1 }
 0x6a3   : > { %v3351_v45 = vpop.f32.mrb[82].mxu0  ;;  %v3497_v47 = vpop.f32.mrb[82].mxu1 }
 0x6a4   : > { %v4475_v12 = vpop.f32.mrb[83].mxu0  ;;  %v4499_v49 = vpop.f32.mrb[83].mxu1 }
 0x6b1   : > { %v3415_v44 = vpop.f32.mrb[84].mxu0 }
 0x6b2   : > { %v3416_v52 = vadd.f32 %v3415_v44, %v3348_v42  ;;  %v4486_v56 = vpop.f32.mrb[85].mxu0 }
 0x6b3   : > { %v3418_v58 = vpop.f32.mrb[86].mxu0 }
 0x6b4   : > { %v4487_v2 = vpop.f32.mrb[87].mxu0  ;;  %v3500_v59 = vadd.f32 %v3494_v41, %v3416_v52 }
 0x6c1   : > { %v3574_v54 = vpop.f32.mrb[88].mxu0 }
 0x6c2   : > { %v3580_v51 = vadd.f32 %v3574_v54, %v3500_v59  ;;  %v4510_v63 = vpop.f32.mrb[89].mxu0 }
 0x6c3   : > { %v3577_v60 = vpop.f32.mrb[90].mxu0 }
 0x6c4   : > { %v3588_v0 = vadd.f32 %v3904_v61, %v3580_v51  ;;  %v4511_v48 = vpop.f32.mrb[91].mxu0 }
 0x6c6   : > { %3589 = vst [vmem:[%s440_s19] sm:$0xff] %v3588_v0 }
 0x6c7 PF: > { %s23_s25 = sadd.s32 1, %s4700_s25  }
 0x6c8   : > { %p20_p5 = scmp.ge.s32.totalorder %s23_s25, 4  }
 0x6ca   :  { %22 = sbr.rel (!%p20_p5) target bundleno = 1 (0x1), region = 144 }

</bundles_post_ra>
